<compile_context>
chip_gen: v7x
topology: tpu7x:2x2x1
jax: 0.10.0
libtpu: 0.0.40
codegen_flags: <defaults>
</compile_context>

<pallas_src>
import functools

import jax
import jax.numpy as jnp
from jax.experimental import pallas as pl
from jax.experimental.pallas import tpu as pltpu


LANE = 128                     # output-channel pad target (lane-dense stores)
SUB = 16                       # reduction-side channel pad (bf16 sublane pack)
VMEM_LIMIT = 32 * 1024 * 1024  # safe on v5e/v6e/v7x


def _round_up(x, m):
    return (x + m - 1) // m * m


def _pick_tile(n):
    """Row-tile size: <=256 rows; >=2 grid steps when there is enough work."""
    t = min(256, _round_up(n, SUB))
    if _round_up(n, t) // t < 2 and n >= 128:
        t = _round_up((n + 1) // 2, SUB)
    return t


# -----------------------------------------------------------------------------
# Pallas kernels
# -----------------------------------------------------------------------------
def _linear_kernel(x_ref, w_ref, b_ref, o_ref, *, activation):
    """Row-tile matmul (bf16 MXU, f32 accum) + bias + optional ReLU."""
    y = jnp.dot(x_ref[...], w_ref[...], preferred_element_type=jnp.float32)
    y = y + b_ref[...]                      # f32 epilogue (v5e-safe)
    if activation == "relu":
        y = jnp.maximum(y, 0.0)
    o_ref[...] = y.astype(o_ref.dtype)


def pallas_linear(x, w, b, activation=None, out_dtype=jnp.bfloat16):
    """x: (N, K) bf16, w: (K, 128) bf16, b: (1, 128) f32 -> (N, 128) out_dtype."""
    N, K = x.shape
    Cout = w.shape[1]
    tile_n = _pick_tile(N)
    N_pad = _round_up(N, tile_n)
    if N_pad != N:
        x = jnp.pad(x, ((0, N_pad - N), (0, 0)))
    out = pl.pallas_call(
        functools.partial(_linear_kernel, activation=activation),
        out_shape=jax.ShapeDtypeStruct((N_pad, Cout), out_dtype),
        grid=(N_pad // tile_n,),
        in_specs=[
            pl.BlockSpec((tile_n, K), lambda i: (i, 0)),
            pl.BlockSpec((K, Cout), lambda i: (0, 0)),
            pl.BlockSpec((1, Cout), lambda i: (0, 0)),
        ],
        out_specs=pl.BlockSpec((tile_n, Cout), lambda i: (i, 0)),
        compiler_params=pltpu.CompilerParams(
            dimension_semantics=("parallel",),
            vmem_limit_bytes=VMEM_LIMIT),
    )(x, w, b)
    return out[:N] if N_pad != N else out


def _phase_linear_kernel(x_ref, w_ref, b_ref, o_ref, *, activation):
    """Per-phase matmul for the phase-decomposed transposed conv."""
    y = jnp.dot(x_ref[0], w_ref[0], preferred_element_type=jnp.float32)
    y = y + b_ref[...]
    if activation == "relu":
        y = jnp.maximum(y, 0.0)
    o_ref[0] = y.astype(o_ref.dtype)


def pallas_phase_linear(cols, w, b, activation, out_dtype):
    """cols: (4, N, Ksub) bf16, w: (4, Ksub, 128) bf16, b: (1, 128) f32."""
    P, N, K = cols.shape
    Cout = w.shape[-1]
    tile_n = _pick_tile(N)
    N_pad = _round_up(N, tile_n)
    if N_pad != N:
        cols = jnp.pad(cols, ((0, 0), (0, N_pad - N), (0, 0)))
    out = pl.pallas_call(
        functools.partial(_phase_linear_kernel, activation=activation),
        out_shape=jax.ShapeDtypeStruct((P, N_pad, Cout), out_dtype),
        grid=(P, N_pad // tile_n),
        in_specs=[
            pl.BlockSpec((1, tile_n, K), lambda p, i: (p, i, 0)),
            pl.BlockSpec((1, K, Cout), lambda p, i: (p, 0, 0)),
            pl.BlockSpec((1, Cout), lambda p, i: (0, 0)),
        ],
        out_specs=pl.BlockSpec((1, tile_n, Cout), lambda p, i: (p, i, 0)),
        compiler_params=pltpu.CompilerParams(
            dimension_semantics=("parallel", "parallel"),
            vmem_limit_bytes=VMEM_LIMIT),
    )(cols, w, b)
    return out[:, :N] if N_pad != N else out


def _res_block_kernel(cols_ref, w3_ref, b3_ref, w1_ref, b1_ref, xres_ref, o_ref):
    """Fused residual block: conv3x3(relu(x)) -> relu -> conv1x1 -> + x."""
    h = jnp.dot(cols_ref[...], w3_ref[...], preferred_element_type=jnp.float32)
    h = jnp.maximum(h + b3_ref[...], 0.0)
    # NOTE: the 1x1 conv contracts the in-register 128-wide intermediate; no
    # HBM traffic is saved by de-padding this K, so it is kept at 128.
    h = jnp.dot(h.astype(w1_ref.dtype), w1_ref[...],
                preferred_element_type=jnp.float32)
    h = h + b1_ref[...]
    o_ref[...] = (xres_ref[...].astype(jnp.float32) + h).astype(o_ref.dtype)


def pallas_res_block(cols, w3, b3, w1, b1, x_res):
    """cols: (N, 9*c16) bf16 patches of relu(x); x_res: (N, 128) bf16 skip."""
    N, K = cols.shape
    C = w1.shape[1]
    tile_n = _pick_tile(N)
    N_pad = _round_up(N, tile_n)
    if N_pad != N:
        cols = jnp.pad(cols, ((0, N_pad - N), (0, 0)))
        x_res = jnp.pad(x_res, ((0, N_pad - N), (0, 0)))
    out = pl.pallas_call(
        _res_block_kernel,
        out_shape=jax.ShapeDtypeStruct((N_pad, C), jnp.bfloat16),
        grid=(N_pad // tile_n,),
        in_specs=[
            pl.BlockSpec((tile_n, K), lambda i: (i, 0)),
            pl.BlockSpec((K, C), lambda i: (0, 0)),
            pl.BlockSpec((1, C), lambda i: (0, 0)),
            pl.BlockSpec((C, C), lambda i: (0, 0)),
            pl.BlockSpec((1, C), lambda i: (0, 0)),
            pl.BlockSpec((tile_n, C), lambda i: (i, 0)),
        ],
        out_specs=pl.BlockSpec((tile_n, C), lambda i: (i, 0)),
        compiler_params=pltpu.CompilerParams(
            dimension_semantics=("parallel",),
            vmem_limit_bytes=VMEM_LIMIT),
    )(cols, w3, b3, w1, b1, x_res)
    return out[:N] if N_pad != N else out


def _vq_kernel(z_ref, cb_ref, esq_ref, zq_ref):
    """Nearest-code quantization (bf16 MXU distances, f32 argmin)."""
    z = z_ref[...]                                   # (tile, Dp) bf16
    cb = cb_ref[...]                                 # (Kp, Dp)   bf16
    # ||e||^2 - 2 z.e   (||z||^2 dropped: argmin-invariant); padded codes 1e30
    cross = jax.lax.dot_general(z, cb, (((1,), (1,)), ((), ())),
                                preferred_element_type=jnp.float32)
    d = esq_ref[...] - 2.0 * cross                   # (tile, Kp) f32
    Kp = d.shape[1]
    col = jax.lax.broadcasted_iota(jnp.int32, d.shape, 1)
    d_min = jnp.min(d, axis=1, keepdims=True)
    idx = jnp.min(jnp.where(d <= d_min, col, Kp), axis=1, keepdims=True)
    onehot = (col == idx).astype(cb.dtype)           # bf16 0/1, exact
    zq = jnp.dot(onehot, cb, preferred_element_type=jnp.float32)
    zq_ref[...] = zq.astype(zq_ref.dtype)


def pallas_vector_quantize(z_flat, cb, esq):
    """z_flat: (N, 128) bf16; cb: (Kp, 128) bf16; esq: (1, Kp) f32 -> (N, 128) bf16."""
    N, Dp = z_flat.shape
    Kp = cb.shape[0]
    tile_n = _pick_tile(N)
    N_pad = _round_up(N, tile_n)
    if N_pad != N:
        z_flat = jnp.pad(z_flat, ((0, N_pad - N), (0, 0)))
    zq = pl.pallas_call(
        _vq_kernel,
        out_shape=jax.ShapeDtypeStruct((N_pad, Dp), jnp.bfloat16),
        grid=(N_pad // tile_n,),
        in_specs=[
            pl.BlockSpec((tile_n, Dp), lambda i: (i, 0)),
            pl.BlockSpec((Kp, Dp), lambda i: (0, 0)),
            pl.BlockSpec((1, Kp), lambda i: (0, 0)),
        ],
        out_specs=pl.BlockSpec((tile_n, Dp), lambda i: (i, 0)),
        compiler_params=pltpu.CompilerParams(
            dimension_semantics=("parallel",),
            vmem_limit_bytes=VMEM_LIMIT),
    )(z_flat, cb, esq)
    return zq[:N] if N_pad != N else zq


# -----------------------------------------------------------------------------
# Conv plumbing (NHWC; im2col glue in plain JAX, matmuls in Pallas)
# -----------------------------------------------------------------------------
def _im2col_nhwc(x, k, stride, pad):
    """x: (B, H, W, C) -> patches (B*Ho*Wo, k*k*C), patch order (kh, kw, C)."""
    B, H, W, C = x.shape
    xp = jnp.pad(x, ((0, 0), (pad, pad), (pad, pad), (0, 0)))
    Hp, Wp = H + 2 * pad, W + 2 * pad
    Ho = (Hp - k) // stride + 1
    Wo = (Wp - k) // stride + 1
    slabs = []
    for i in range(k):
        for j in range(k):
            slabs.append(xp[:, i:i + stride * Ho:stride, j:j + stride * Wo:stride, :])
    cols = jnp.stack(slabs, axis=3)                 # (B, Ho, Wo, k*k, C)
    return cols.reshape(B * Ho * Wo, k * k * C), Ho, Wo


def conv2d_nhwc(h, c, activation=None, out_dtype=jnp.bfloat16):
    """h: (B,H,W,>=cin_slice) bf16 -> (B,Ho,Wo,128) out_dtype."""
    B = h.shape[0]
    hs = h[..., :c["cin_slice"]]                    # de-pad the reduction side
    cols, Ho, Wo = _im2col_nhwc(hs, c["k"], c["stride"], c["pad"])
    y = pallas_linear(cols, c["w"], c["b"], activation, out_dtype)
    return y.reshape(B, Ho, Wo, LANE)


def conv_transpose2d_phase(h, c, activation=None, out_dtype=jnp.bfloat16):
    """ConvTranspose2d (stride 2, even k) via 4 sub-pixel phases, one pallas_call."""
    B, H, W, _ = h.shape
    cs = c["cin_slice"]
    offs = c["offs"]                                # per output-phase input offsets
    hs = h[..., :cs]
    all_off = [o for a in (0, 1) for o in offs[a]]
    plo = max(0, -min(all_off))
    phi = max(0, max(all_off))
    hp = jnp.pad(hs, ((0, 0), (plo, phi), (plo, phi), (0, 0)))
    phases = []
    for a in (0, 1):
        for b in (0, 1):
            slabs = []
            for oy in offs[a]:
                for ox in offs[b]:
                    slabs.append(hp[:, plo + oy:plo + oy + H,
                                       plo + ox:plo + ox + W, :])
            cols = jnp.stack(slabs, axis=3).reshape(
                B * H * W, len(offs[a]) * len(offs[b]) * cs)
            phases.append(cols)
    cols4 = jnp.stack(phases, axis=0)               # (4, B*H*W, (k/2)^2*cs)
    y = pallas_phase_linear(cols4, c["w"], c["b"], activation, out_dtype)
    # interleave phases: out[:, 2q+a, 2r+b, :] = phase[a*2+b][:, q, r, :]
    y = y.reshape(2, 2, B, H, W, LANE).transpose(2, 3, 0, 4, 1, 5)
    return y.reshape(B, 2 * H, 2 * W, LANE)


def res_block_nhwc(h, rp):
    """x + conv1x1(relu(conv3x3(relu(x)))) as a single fused pallas_call."""
    B, H, W, C = h.shape
    hr = jnp.maximum(h[..., :rp["cin_slice"]], 0)   # pre-activation, de-padded
    cols, _, _ = _im2col_nhwc(hr, 3, 1, 1)
    y = pallas_res_block(cols, rp["w3"], rp["b3"], rp["w1"], rp["b1"],
                         h.reshape(B * H * W, C))
    return y.reshape(B, H, W, C)


# -----------------------------------------------------------------------------
# Parameter init (PyTorch layouts) and kernel-ready preprocessing
# -----------------------------------------------------------------------------
def init_vqvae_params(key, in_channels, latent_dim, hidden, kernel_sizes,
                      res_layers, code_book_size):
    keys = iter(jax.random.split(key, 128))

    def conv_w(shape):
        fan_in = shape[1] * shape[2] * shape[3]
        return (jax.random.normal(next(keys), shape, jnp.float32)
                / jnp.sqrt(jnp.float32(fan_in)))

    enc_channels = [in_channels] + [hidden] * (len(kernel_sizes) - 1) + [latent_dim]
    dec_channels = [latent_dim] + [hidden] * (len(kernel_sizes) - 1) + [in_channels]

    params = {"enc_convs": [], "enc_res": [], "dec_res": [], "dec_convs": []}
    for li, k in enumerate(kernel_sizes):
        cin, cout = enc_channels[li], enc_channels[li + 1]
        params["enc_convs"].append(
            {"w": conv_w((cout, cin, k, k)), "b": jnp.zeros((cout,), jnp.float32), "k": k})
    for _ in range(res_layers):
        params["enc_res"].append({
            "w3": conv_w((latent_dim, latent_dim, 3, 3)), "b3": jnp.zeros((latent_dim,)),
            "w1": conv_w((latent_dim, latent_dim, 1, 1)), "b1": jnp.zeros((latent_dim,))})
        params["dec_res"].append({
            "w3": conv_w((latent_dim, latent_dim, 3, 3)), "b3": jnp.zeros((latent_dim,)),
            "w1": conv_w((latent_dim, latent_dim, 1, 1)), "b1": jnp.zeros((latent_dim,))})
    for li, k in enumerate(reversed(kernel_sizes)):
        cin, cout = dec_channels[li], dec_channels[li + 1]
        # PyTorch ConvTranspose2d weight layout: (Cin, Cout, k, k)
        wt = (jax.random.normal(next(keys), (cin, cout, k, k), jnp.float32)
              / jnp.sqrt(jnp.float32(cin * k * k)))
        params["dec_convs"].append({"w": wt, "b": jnp.zeros((cout,), jnp.float32), "k": k})

    params["codebook"] = jax.random.uniform(
        next(keys), (code_book_size, latent_dim), jnp.float32,
        minval=-1.0 / code_book_size, maxval=1.0 / code_book_size)
    return params


def _prep_conv_w(w, cin_slice):
    """(Cout, Cin, k, k) f32 -> im2col-ordered (k*k*cin_slice, 128) bf16."""
    Cout, Cin, k, _ = w.shape
    wp = jnp.zeros((LANE, cin_slice, k, k), jnp.float32).at[:Cout, :Cin].set(w)
    return wp.transpose(2, 3, 1, 0).reshape(k * k * cin_slice, LANE).astype(jnp.bfloat16)


def _prep_1x1_w(w):
    """(Cout, Cin, 1, 1) f32 -> (128, 128) bf16 (contracts the in-register 128)."""
    Cout, Cin = w.shape[0], w.shape[1]
    wp = jnp.zeros((LANE, LANE), jnp.float32).at[:Cin, :Cout].set(w[:, :, 0, 0].T)
    return wp.astype(jnp.bfloat16)


def _prep_deconv_phase_w(w_t, k, p, cin_slice):
    """ConvTranspose2d (Cin,Cout,k,k) -> per-phase weights (4, (k/2)^2*cin_slice, 128).

    For output position oy = 2*q + a:  kh = oy + p - 2*iy, so per phase `a` the
    contributing taps are kh with parity (a+p)%2 at input offset (a+p-kh)//2.
    """
    Cin, Cout = w_t.shape[0], w_t.shape[1]
    taps = []
    for a in (0, 1):
        taps.append([(kh, (a + p - kh) // 2)
                     for kh in range(k) if (kh % 2) == ((a + p) % 2)])
    w_phases = []
    for a in (0, 1):
        for b in (0, 1):
            rows = []
            for (kh, _) in taps[a]:
                for (kw, _) in taps[b]:
                    blk = jnp.zeros((cin_slice, LANE), jnp.float32)
                    blk = blk.at[:Cin, :Cout].set(w_t[:, :, kh, kw])
                    rows.append(blk)
            w_phases.append(jnp.concatenate(rows, axis=0))
    w_all = jnp.stack(w_phases, axis=0).astype(jnp.bfloat16)
    offs = [[off for (_, off) in taps[a]] for a in (0, 1)]
    return w_all, offs


def prepare_params(params, in_channels, latent_dim, hidden):
    del in_channels, hidden  # channel counts are derived from weight shapes

    def pad_bias(b):
        return jnp.zeros((1, LANE), jnp.float32).at[0, :b.shape[0]].set(
            b.astype(jnp.float32))

    prep = {"cfg": {"latent_dim": latent_dim},
            "enc_convs": [], "enc_res": [], "dec_res": [], "dec_convs": []}

    for c in params["enc_convs"]:
        w, k = c["w"], c["k"]
        cin_slice = _round_up(w.shape[1], SUB)
        prep["enc_convs"].append({
            "w": _prep_conv_w(w, cin_slice), "b": pad_bias(c["b"]),
            "k": k, "stride": 2, "pad": (k - 2) // 2, "cin_slice": cin_slice})

    def prep_res(rp):
        cin_slice = _round_up(rp["w3"].shape[1], SUB)
        return {"w3": _prep_conv_w(rp["w3"], cin_slice), "b3": pad_bias(rp["b3"]),
                "w1": _prep_1x1_w(rp["w1"]), "b1": pad_bias(rp["b1"]),
                "cin_slice": cin_slice}

    for rp in params["enc_res"]:
        prep["enc_res"].append(prep_res(rp))
    for rp in params["dec_res"]:
        prep["dec_res"].append(prep_res(rp))

    for c in params["dec_convs"]:
        w, k = c["w"], c["k"]
        assert k % 2 == 0, "phase-decomposed deconv assumes even kernel, stride 2"
        cin_slice = _round_up(w.shape[0], SUB)
        pad = (k - 2) // 2
        w_ph, offs = _prep_deconv_phase_w(w, k, pad, cin_slice)
        prep["dec_convs"].append({
            "w": w_ph, "b": pad_bias(c["b"]), "k": k, "pad": pad,
            "offs": offs, "cin_slice": cin_slice})

    K, D = params["codebook"].shape
    k_pad = _round_up(K, LANE)
    cb = jnp.zeros((k_pad, LANE), jnp.float32).at[:K, :D].set(params["codebook"])
    cb_bf = cb.astype(jnp.bfloat16)
    e_sq = jnp.sum(jnp.square(cb_bf.astype(jnp.float32)), axis=1)
    e_sq = jnp.where(jnp.arange(k_pad) < K, e_sq, 1e30).reshape(1, k_pad)
    prep["codebook"] = cb_bf
    prep["codebook_sq"] = e_sq
    return prep


# -----------------------------------------------------------------------------
# VQ-VAE forward
# -----------------------------------------------------------------------------
def vq_vae_forward(prep, x, beta=0.25):
    latent_dim = prep["cfg"]["latent_dim"]
    B, Cin, H, W = x.shape

    # NCHW f32 -> NHWC bf16 with the reduction-side channel pad only
    cs0 = prep["enc_convs"][0]["cin_slice"]
    h = jnp.zeros((B, H, W, cs0), jnp.bfloat16).at[..., :Cin].set(
        x.transpose(0, 2, 3, 1).astype(jnp.bfloat16))

    # -------- Encoder --------
    n_down = len(prep["enc_convs"])
    for li, c in enumerate(prep["enc_convs"]):
        act = "relu" if li < n_down - 1 else None
        h = conv2d_nhwc(h, c, activation=act)
    for rp in prep["enc_res"]:
        h = res_block_nhwc(h, rp)

    # -------- Quantization --------
    Bz, Hl, Wl, _ = h.shape
    z_flat = h.reshape(Bz * Hl * Wl, LANE)
    zq_flat = pallas_vector_quantize(z_flat, prep["codebook"], prep["codebook_sq"])
    # padded channels are exactly zero in both z and z_q, so the full-width sum
    # equals the real-channel sum; denominator uses the real latent dim.
    diff = zq_flat.astype(jnp.float32) - z_flat.astype(jnp.float32)
    mse = jnp.sum(jnp.square(diff)) / jnp.float32(z_flat.shape[0] * latent_dim)
    # loss = mse(sg(z), e) + beta * mse(z, sg(e)); both values equal MSE(z_q, z)
    quant_loss = (1.0 + beta) * mse
    # straight-through: z + sg(z_q - z) == z_q in the forward value
    h = zq_flat.reshape(Bz, Hl, Wl, LANE)

    # -------- Decoder --------
    for rp in prep["dec_res"]:
        h = res_block_nhwc(h, rp)
    n_up = len(prep["dec_convs"])
    for li, c in enumerate(prep["dec_convs"]):
        last = li == n_up - 1
        h = conv_transpose2d_phase(
            h, c, activation=None if last else "relu",
            out_dtype=jnp.float32 if last else jnp.bfloat16)

    x_hat = h[..., :Cin].transpose(0, 3, 1, 2)      # back to NCHW f32
    return x_hat, quant_loss


# -----------------------------------------------------------------------------
# Main
# -----------------------------------------------------------------------------
if __name__ == "__main__":
    in_channels = 3
    latent_dimension = 8
    hidden = 16
    kernel_sizes = [4, 4]          # two stride-2 downsampling convs
    res_layers = 2
    code_book_size = 32

    key = jax.random.PRNGKey(0)
    kp, kx = jax.random.split(key)
    raw_params = init_vqvae_params(kp, in_channels, latent_dimension, hidden,
                                   kernel_sizes, res_layers, code_book_size)
    prep = prepare_params(raw_params, in_channels, latent_dimension, hidden)

    x = jax.random.normal(kx, (2, in_channels, 16, 16), jnp.float32)  # NCHW

    fwd = jax.jit(functools.partial(vq_vae_forward, prep))
    x_hat, quant_loss = fwd(x)
    jax.block_until_ready((x_hat, quant_loss))

    assert x_hat.shape == x.shape, x_hat.shape
    assert quant_loss.shape == (), quant_loss.shape
    assert bool(jnp.isfinite(x_hat).all()) and bool(jnp.isfinite(quant_loss))
    print("KERNEL_OK")
</pallas_src>

<mosaic_0001>
module attributes {stable_mosaic.version = 11 : i64} {
  func.func @_linear_kernel(%arg0: i32, %arg1: memref<64x256xbf16, #tpu.memory_space<vmem>>, %arg2: memref<256x128xbf16, #tpu.memory_space<vmem>>, %arg3: memref<1x128xf32, #tpu.memory_space<vmem>>, %arg4: memref<64x128xbf16, #tpu.memory_space<vmem>>) attributes {dimension_semantics = [#tpu.dimension_semantics<parallel>], iteration_bounds = array<i64: 2>, scalar_prefetch = 0 : i64, scratch_operands = 0 : i64, tpu.core_type = #tpu.core_type<tc>, window_params = [{transform_indices = @transform_0, window_bounds = array<i64: 64, 256>}, {pipeline_mode = #tpu.pipeline_mode<synchronous>, transform_indices = @transform_1, window_bounds = array<i64: 256, 128>}, {pipeline_mode = #tpu.pipeline_mode<synchronous>, transform_indices = @transform_2, window_bounds = array<i64: 1, 128>}, {transform_indices = @transform_3, window_bounds = array<i64: 64, 128>}]} {
    %c0 = arith.constant 0 : index
    %c0_0 = arith.constant 0 : index
    %0 = vector.load %arg1[%c0, %c0_0] : memref<64x256xbf16, #tpu.memory_space<vmem>>, vector<64x256xbf16>
    %c0_1 = arith.constant 0 : index
    %c0_2 = arith.constant 0 : index
    %1 = vector.load %arg2[%c0_1, %c0_2] : memref<256x128xbf16, #tpu.memory_space<vmem>>, vector<256x128xbf16>
    %cst = arith.constant dense<0.000000e+00> : vector<64x128xf32>
    %2 = tpu.matmul %0, %1, %cst {dimension_numbers = #tpu.dot_dimension_numbers<[1], [0], [0], [1], [0, 0, 1, 1], [], []>} : vector<64x256xbf16>, vector<256x128xbf16>, vector<64x128xf32> -> vector<64x128xf32>
    %c0_3 = arith.constant 0 : index
    %c0_4 = arith.constant 0 : index
    %3 = vector.load %arg3[%c0_3, %c0_4] : memref<1x128xf32, #tpu.memory_space<vmem>>, vector<1x128xf32>
    %4 = vector.broadcast %3 : vector<1x128xf32> to vector<64x128xf32>
    %5 = arith.addf %2, %4 : vector<64x128xf32>
    %cst_5 = arith.constant 0.000000e+00 : f32
    %6 = vector.broadcast %cst_5 : f32 to vector<64x128xf32>
    %7 = arith.maximumf %5, %6 : vector<64x128xf32>
    %8 = arith.truncf %7 : vector<64x128xf32> to vector<64x128xbf16>
    %c0_6 = arith.constant 0 : index
    %c0_7 = arith.constant 0 : index
    %9 = vector.load %arg4[%c0_6, %c0_7] : memref<64x128xbf16, #tpu.memory_space<vmem>>, vector<64x128xbf16>
    tpu.vector_store %arg4[%c0_6, %c0_7], %8 {strides = array<i32>} : memref<64x128xbf16, #tpu.memory_space<vmem>>, vector<64x128xbf16>,
    return
  }
  func.func @transform_0(%arg0: i32) -> (i32, i32) {
    %c0_i32 = arith.constant 0 : i32
    %c0_i32_0 = arith.constant 0 : i32
    return %arg0, %c0_i32 : i32, i32
  }
  func.func @transform_1(%arg0: i32) -> (i32, i32) {
    %c0_i32 = arith.constant 0 : i32
    %c0_i32_0 = arith.constant 0 : i32
    %c0_i32_1 = arith.constant 0 : i32
    return %c0_i32, %c0_i32_0 : i32, i32
  }
  func.func @transform_2(%arg0: i32) -> (i32, i32) {
    %c0_i32 = arith.constant 0 : i32
    %c0_i32_0 = arith.constant 0 : i32
    %c0_i32_1 = arith.constant 0 : i32
    return %c0_i32, %c0_i32_0 : i32, i32
  }
  func.func @transform_3(%arg0: i32) -> (i32, i32) {
    %c0_i32 = arith.constant 0 : i32
    %c0_i32_0 = arith.constant 0 : i32
    return %arg0, %c0_i32 : i32, i32
  }
}

module attributes {stable_mosaic.version = 11 : i64} {
  func.func @_linear_kernel(%arg0: i32, %arg1: memref<32x256xbf16, #tpu.memory_space<vmem>>, %arg2: memref<256x128xbf16, #tpu.memory_space<vmem>>, %arg3: memref<1x128xf32, #tpu.memory_space<vmem>>, %arg4: memref<32x128xbf16, #tpu.memory_space<vmem>>) attributes {dimension_semantics = [#tpu.dimension_semantics<parallel>], iteration_bounds = array<i64: 1>, scalar_prefetch = 0 : i64, scratch_operands = 0 : i64, tpu.core_type = #tpu.core_type<tc>, window_params = [{transform_indices = @transform_0, window_bounds = array<i64: 32, 256>}, {pipeline_mode = #tpu.pipeline_mode<synchronous>, transform_indices = @transform_1, window_bounds = array<i64: 256, 128>}, {pipeline_mode = #tpu.pipeline_mode<synchronous>, transform_indices = @transform_2, window_bounds = array<i64: 1, 128>}, {transform_indices = @transform_3, window_bounds = array<i64: 32, 128>}]} {
    %c0 = arith.constant 0 : index
    %c0_0 = arith.constant 0 : index
    %0 = vector.load %arg1[%c0, %c0_0] : memref<32x256xbf16, #tpu.memory_space<vmem>>, vector<32x256xbf16>
    %c0_1 = arith.constant 0 : index
    %c0_2 = arith.constant 0 : index
    %1 = vector.load %arg2[%c0_1, %c0_2] : memref<256x128xbf16, #tpu.memory_space<vmem>>, vector<256x128xbf16>
    %cst = arith.constant dense<0.000000e+00> : vector<32x128xf32>
    %2 = tpu.matmul %0, %1, %cst {dimension_numbers = #tpu.dot_dimension_numbers<[1], [0], [0], [1], [0, 0, 1, 1], [], []>} : vector<32x256xbf16>, vector<256x128xbf16>, vector<32x128xf32> -> vector<32x128xf32>
    %c0_3 = arith.constant 0 : index
    %c0_4 = arith.constant 0 : index
    %3 = vector.load %arg3[%c0_3, %c0_4] : memref<1x128xf32, #tpu.memory_space<vmem>>, vector<1x128xf32>
    %4 = vector.broadcast %3 : vector<1x128xf32> to vector<32x128xf32>
    %5 = arith.addf %2, %4 : vector<32x128xf32>
    %6 = arith.truncf %5 : vector<32x128xf32> to vector<32x128xbf16>
    %c0_5 = arith.constant 0 : index
    %c0_6 = arith.constant 0 : index
    %7 = vector.load %arg4[%c0_5, %c0_6] : memref<32x128xbf16, #tpu.memory_space<vmem>>, vector<32x128xbf16>
    tpu.vector_store %arg4[%c0_5, %c0_6], %6 {strides = array<i32>} : memref<32x128xbf16, #tpu.memory_space<vmem>>, vector<32x128xbf16>,
    return
  }
  func.func @transform_0(%arg0: i32) -> (i32, i32) {
    %c0_i32 = arith.constant 0 : i32
    %c0_i32_0 = arith.constant 0 : i32
    return %arg0, %c0_i32 : i32, i32
  }
  func.func @transform_1(%arg0: i32) -> (i32, i32) {
    %c0_i32 = arith.constant 0 : i32
    %c0_i32_0 = arith.constant 0 : i32
    %c0_i32_1 = arith.constant 0 : i32
    return %c0_i32, %c0_i32_0 : i32, i32
  }
  func.func @transform_2(%arg0: i32) -> (i32, i32) {
    %c0_i32 = arith.constant 0 : i32
    %c0_i32_0 = arith.constant 0 : i32
    %c0_i32_1 = arith.constant 0 : i32
    return %c0_i32, %c0_i32_0 : i32, i32
  }
  func.func @transform_3(%arg0: i32) -> (i32, i32) {
    %c0_i32 = arith.constant 0 : i32
    %c0_i32_0 = arith.constant 0 : i32
    return %arg0, %c0_i32 : i32, i32
  }
}

module attributes {stable_mosaic.version = 11 : i64} {
  func.func @_res_block_kernel(%arg0: i32, %arg1: memref<32x144xbf16, #tpu.memory_space<vmem>>, %arg2: memref<144x128xbf16, #tpu.memory_space<vmem>>, %arg3: memref<1x128xf32, #tpu.memory_space<vmem>>, %arg4: memref<128x128xbf16, #tpu.memory_space<vmem>>, %arg5: memref<1x128xf32, #tpu.memory_space<vmem>>, %arg6: memref<32x128xbf16, #tpu.memory_space<vmem>>, %arg7: memref<32x128xbf16, #tpu.memory_space<vmem>>) attributes {dimension_semantics = [#tpu.dimension_semantics<parallel>], iteration_bounds = array<i64: 1>, scalar_prefetch = 0 : i64, scratch_operands = 0 : i64, tpu.core_type = #tpu.core_type<tc>, window_params = [{transform_indices = @transform_0, window_bounds = array<i64: 32, 144>}, {pipeline_mode = #tpu.pipeline_mode<synchronous>, transform_indices = @transform_1, window_bounds = array<i64: 144, 128>}, {pipeline_mode = #tpu.pipeline_mode<synchronous>, transform_indices = @transform_2, window_bounds = array<i64: 1, 128>}, {pipeline_mode = #tpu.pipeline_mode<synchronous>, transform_indices = @transform_3, window_bounds = array<i64: 128, 128>}, {pipeline_mode = #tpu.pipeline_mode<synchronous>, transform_indices = @transform_4, window_bounds = array<i64: 1, 128>}, {transform_indices = @transform_5, window_bounds = array<i64: 32, 128>}, {transform_indices = @transform_6, window_bounds = array<i64: 32, 128>}]} {
    %c0 = arith.constant 0 : index
    %c0_0 = arith.constant 0 : index
    %0 = vector.load %arg1[%c0, %c0_0] : memref<32x144xbf16, #tpu.memory_space<vmem>>, vector<32x144xbf16>
    %c0_1 = arith.constant 0 : index
    %c0_2 = arith.constant 0 : index
    %1 = vector.load %arg2[%c0_1, %c0_2] : memref<144x128xbf16, #tpu.memory_space<vmem>>, vector<144x128xbf16>
    %cst = arith.constant dense<0.000000e+00> : vector<32x128xf32>
    %2 = tpu.matmul %0, %1, %cst {dimension_numbers = #tpu.dot_dimension_numbers<[1], [0], [0], [1], [0, 0, 1, 1], [], []>} : vector<32x144xbf16>, vector<144x128xbf16>, vector<32x128xf32> -> vector<32x128xf32>
    %c0_3 = arith.constant 0 : index
    %c0_4 = arith.constant 0 : index
    %3 = vector.load %arg3[%c0_3, %c0_4] : memref<1x128xf32, #tpu.memory_space<vmem>>, vector<1x128xf32>
    %4 = vector.broadcast %3 : vector<1x128xf32> to vector<32x128xf32>
    %5 = arith.addf %2, %4 : vector<32x128xf32>
    %cst_5 = arith.constant 0.000000e+00 : f32
    %6 = vector.broadcast %cst_5 : f32 to vector<32x128xf32>
    %7 = arith.maximumf %5, %6 : vector<32x128xf32>
    %8 = arith.truncf %7 : vector<32x128xf32> to vector<32x128xbf16>
    %c0_6 = arith.constant 0 : index
    %c0_7 = arith.constant 0 : index
    %9 = vector.load %arg4[%c0_6, %c0_7] : memref<128x128xbf16, #tpu.memory_space<vmem>>, vector<128x128xbf16>
    %cst_8 = arith.constant dense<0.000000e+00> : vector<32x128xf32>
    %10 = tpu.matmul %8, %9, %cst_8 {dimension_numbers = #tpu.dot_dimension_numbers<[1], [0], [0], [1], [0, 0, 1, 1], [], []>} : vector<32x128xbf16>, vector<128x128xbf16>, vector<32x128xf32> -> vector<32x128xf32>
    %c0_9 = arith.constant 0 : index
    %c0_10 = arith.constant 0 : index
    %11 = vector.load %arg5[%c0_9, %c0_10] : memref<1x128xf32, #tpu.memory_space<vmem>>, vector<1x128xf32>
    %12 = vector.broadcast %11 : vector<1x128xf32> to vector<32x128xf32>
    %13 = arith.addf %10, %12 : vector<32x128xf32>
    %c0_11 = arith.constant 0 : index
    %c0_12 = arith.constant 0 : index
    %14 = vector.load %arg6[%c0_11, %c0_12] : memref<32x128xbf16, #tpu.memory_space<vmem>>, vector<32x128xbf16>
    %15 = arith.extf %14 : vector<32x128xbf16> to vector<32x128xf32>
    %16 = arith.addf %15, %13 : vector<32x128xf32>
    %17 = arith.truncf %16 : vector<32x128xf32> to vector<32x128xbf16>
    %c0_13 = arith.constant 0 : index
    %c0_14 = arith.constant 0 : index
    %18 = vector.load %arg7[%c0_13, %c0_14] : memref<32x128xbf16, #tpu.memory_space<vmem>>, vector<32x128xbf16>
    tpu.vector_store %arg7[%c0_13, %c0_14], %17 {strides = array<i32>} : memref<32x128xbf16, #tpu.memory_space<vmem>>, vector<32x128xbf16>,
    return
  }
  func.func @transform_0(%arg0: i32) -> (i32, i32) {
    %c0_i32 = arith.constant 0 : i32
    %c0_i32_0 = arith.constant 0 : i32
    return %arg0, %c0_i32 : i32, i32
  }
  func.func @transform_1(%arg0: i32) -> (i32, i32) {
    %c0_i32 = arith.constant 0 : i32
    %c0_i32_0 = arith.constant 0 : i32
    %c0_i32_1 = arith.constant 0 : i32
    return %c0_i32, %c0_i32_0 : i32, i32
  }
  func.func @transform_2(%arg0: i32) -> (i32, i32) {
    %c0_i32 = arith.constant 0 : i32
    %c0_i32_0 = arith.constant 0 : i32
    %c0_i32_1 = arith.constant 0 : i32
    return %c0_i32, %c0_i32_0 : i32, i32
  }
  func.func @transform_3(%arg0: i32) -> (i32, i32) {
    %c0_i32 = arith.constant 0 : i32
    %c0_i32_0 = arith.constant 0 : i32
    %c0_i32_1 = arith.constant 0 : i32
    return %c0_i32, %c0_i32_0 : i32, i32
  }
  func.func @transform_4(%arg0: i32) -> (i32, i32) {
    %c0_i32 = arith.constant 0 : i32
    %c0_i32_0 = arith.constant 0 : i32
    %c0_i32_1 = arith.constant 0 : i32
    return %c0_i32, %c0_i32_0 : i32, i32
  }
  func.func @transform_5(%arg0: i32) -> (i32, i32) {
    %c0_i32 = arith.constant 0 : i32
    %c0_i32_0 = arith.constant 0 : i32
    return %arg0, %c0_i32 : i32, i32
  }
  func.func @transform_6(%arg0: i32) -> (i32, i32) {
    %c0_i32 = arith.constant 0 : i32
    %c0_i32_0 = arith.constant 0 : i32
    return %arg0, %c0_i32 : i32, i32
  }
}

module attributes {stable_mosaic.version = 11 : i64} {
  func.func @_vq_kernel(%arg0: i32, %arg1: memref<32x128xbf16, #tpu.memory_space<vmem>>, %arg2: memref<128x128xbf16, #tpu.memory_space<vmem>>, %arg3: memref<1x128xf32, #tpu.memory_space<vmem>>, %arg4: memref<32x128xbf16, #tpu.memory_space<vmem>>) attributes {dimension_semantics = [#tpu.dimension_semantics<parallel>], iteration_bounds = array<i64: 1>, scalar_prefetch = 0 : i64, scratch_operands = 0 : i64, tpu.core_type = #tpu.core_type<tc>, window_params = [{transform_indices = @transform_0, window_bounds = array<i64: 32, 128>}, {pipeline_mode = #tpu.pipeline_mode<synchronous>, transform_indices = @transform_1, window_bounds = array<i64: 128, 128>}, {pipeline_mode = #tpu.pipeline_mode<synchronous>, transform_indices = @transform_2, window_bounds = array<i64: 1, 128>}, {transform_indices = @transform_3, window_bounds = array<i64: 32, 128>}]} {
    %c0 = arith.constant 0 : index
    %c0_0 = arith.constant 0 : index
    %0 = vector.load %arg1[%c0, %c0_0] : memref<32x128xbf16, #tpu.memory_space<vmem>>, vector<32x128xbf16>
    %c0_1 = arith.constant 0 : index
    %c0_2 = arith.constant 0 : index
    %1 = vector.load %arg2[%c0_1, %c0_2] : memref<128x128xbf16, #tpu.memory_space<vmem>>, vector<128x128xbf16>
    %cst = arith.constant dense<0.000000e+00> : vector<32x128xf32>
    %2 = tpu.matmul %0, %1, %cst {dimension_numbers = #tpu.dot_dimension_numbers<[1], [1], [0], [0], [0, 0, 1, 0], [], []>} : vector<32x128xbf16>, vector<128x128xbf16>, vector<32x128xf32> -> vector<32x128xf32>
    %c0_3 = arith.constant 0 : index
    %c0_4 = arith.constant 0 : index
    %3 = vector.load %arg3[%c0_3, %c0_4] : memref<1x128xf32, #tpu.memory_space<vmem>>, vector<1x128xf32>
    %cst_5 = arith.constant 2.000000e+00 : f32
    %4 = vector.broadcast %cst_5 : f32 to vector<32x128xf32>
    %5 = arith.mulf %4, %2 : vector<32x128xf32>
    %6 = vector.broadcast %3 : vector<1x128xf32> to vector<32x128xf32>
    %7 = arith.subf %6, %5 : vector<32x128xf32>
    %8 = tpu.iota {dimensions = array<i32: 1>} : vector<32x128xi32>
    %cst_6 = arith.constant dense<0x7F800000> : vector<32xf32>
    %9 = vector.multi_reduction <minimumf>, %7, %cst_6 [1] : vector<32x128xf32> to vector<32xf32>
    %10 = vector.shape_cast %9 : vector<32xf32> to vector<32x1xf32>
    %11 = vector.broadcast %10 : vector<32x1xf32> to vector<32x128xf32>
    %12 = arith.cmpf ole, %7, %11 : vector<32x128xf32>
    %c128_i32 = arith.constant 128 : i32
    %13 = vector.broadcast %c128_i32 : i32 to vector<32x128xi32>
    %14 = arith.select %12, %8, %13 : vector<32x128xi1>, vector<32x128xi32>
    %cst_7 = arith.constant dense<2147483647> : vector<32xi32>
    %15 = vector.multi_reduction <minsi>, %14, %cst_7 [1] : vector<32x128xi32> to vector<32xi32>
    %16 = vector.shape_cast %15 : vector<32xi32> to vector<32x1xi32>
    %17 = vector.broadcast %16 : vector<32x1xi32> to vector<32x128xi32>
    %18 = arith.cmpi eq, %8, %17 : vector<32x128xi32>
    %19 = arith.extui %18 : vector<32x128xi1> to vector<32x128xi32>
    %20 = arith.sitofp %19 : vector<32x128xi32> to vector<32x128xf32>
    %21 = arith.truncf %20 : vector<32x128xf32> to vector<32x128xbf16>
    %cst_8 = arith.constant dense<0.000000e+00> : vector<32x128xf32>
    %22 = tpu.matmul %21, %1, %cst_8 {dimension_numbers = #tpu.dot_dimension_numbers<[1], [0], [0], [1], [0, 0, 1, 1], [], []>} : vector<32x128xbf16>, vector<128x128xbf16>, vector<32x128xf32> -> vector<32x128xf32>
    %23 = arith.truncf %22 : vector<32x128xf32> to vector<32x128xbf16>
    %c0_9 = arith.constant 0 : index
    %c0_10 = arith.constant 0 : index
    %24 = vector.load %arg4[%c0_9, %c0_10] : memref<32x128xbf16, #tpu.memory_space<vmem>>, vector<32x128xbf16>
    tpu.vector_store %arg4[%c0_9, %c0_10], %23 {strides = array<i32>} : memref<32x128xbf16, #tpu.memory_space<vmem>>, vector<32x128xbf16>,
    return
  }
  func.func @transform_0(%arg0: i32) -> (i32, i32) {
    %c0_i32 = arith.constant 0 : i32
    %c0_i32_0 = arith.constant 0 : i32
    return %arg0, %c0_i32 : i32, i32
  }
  func.func @transform_1(%arg0: i32) -> (i32, i32) {
    %c0_i32 = arith.constant 0 : i32
    %c0_i32_0 = arith.constant 0 : i32
    %c0_i32_1 = arith.constant 0 : i32
    return %c0_i32, %c0_i32_0 : i32, i32
  }
  func.func @transform_2(%arg0: i32) -> (i32, i32) {
    %c0_i32 = arith.constant 0 : i32
    %c0_i32_0 = arith.constant 0 : i32
    %c0_i32_1 = arith.constant 0 : i32
    return %c0_i32, %c0_i32_0 : i32, i32
  }
  func.func @transform_3(%arg0: i32) -> (i32, i32) {
    %c0_i32 = arith.constant 0 : i32
    %c0_i32_0 = arith.constant 0 : i32
    return %arg0, %c0_i32 : i32, i32
  }
}

module attributes {stable_mosaic.version = 11 : i64} {
  func.func @_phase_linear_kernel(%arg0: i32, %arg1: i32, %arg2: memref<1x32x64xbf16, #tpu.memory_space<vmem>>, %arg3: memref<1x64x128xbf16, #tpu.memory_space<vmem>>, %arg4: memref<1x128xf32, #tpu.memory_space<vmem>>, %arg5: memref<1x32x128xbf16, #tpu.memory_space<vmem>>) attributes {dimension_semantics = [#tpu.dimension_semantics<parallel>, #tpu.dimension_semantics<parallel>], iteration_bounds = array<i64: 4, 1>, scalar_prefetch = 0 : i64, scratch_operands = 0 : i64, tpu.core_type = #tpu.core_type<tc>, window_params = [{transform_indices = @transform_0, window_bounds = array<i64: 1, 32, 64>}, {transform_indices = @transform_1, window_bounds = array<i64: 1, 64, 128>}, {pipeline_mode = #tpu.pipeline_mode<synchronous>, transform_indices = @transform_2, window_bounds = array<i64: 1, 128>}, {transform_indices = @transform_3, window_bounds = array<i64: 1, 32, 128>}]} {
    %c0 = arith.constant 0 : index
    %c0_0 = arith.constant 0 : index
    %c0_1 = arith.constant 0 : index
    %0 = vector.load %arg2[%c0, %c0_0, %c0_1] : memref<1x32x64xbf16, #tpu.memory_space<vmem>>, vector<1x32x64xbf16>
    %1 = vector.shape_cast %0 : vector<1x32x64xbf16> to vector<32x64xbf16>
    %c0_2 = arith.constant 0 : index
    %c0_3 = arith.constant 0 : index
    %c0_4 = arith.constant 0 : index
    %2 = vector.load %arg3[%c0_2, %c0_3, %c0_4] : memref<1x64x128xbf16, #tpu.memory_space<vmem>>, vector<1x64x128xbf16>
    %3 = vector.shape_cast %2 : vector<1x64x128xbf16> to vector<64x128xbf16>
    %cst = arith.constant dense<0.000000e+00> : vector<32x128xf32>
    %4 = tpu.matmul %1, %3, %cst {dimension_numbers = #tpu.dot_dimension_numbers<[1], [0], [0], [1], [0, 0, 1, 1], [], []>} : vector<32x64xbf16>, vector<64x128xbf16>, vector<32x128xf32> -> vector<32x128xf32>
    %c0_5 = arith.constant 0 : index
    %c0_6 = arith.constant 0 : index
    %5 = vector.load %arg4[%c0_5, %c0_6] : memref<1x128xf32, #tpu.memory_space<vmem>>, vector<1x128xf32>
    %6 = vector.broadcast %5 : vector<1x128xf32> to vector<32x128xf32>
    %7 = arith.addf %4, %6 : vector<32x128xf32>
    %cst_7 = arith.constant 0.000000e+00 : f32
    %8 = vector.broadcast %cst_7 : f32 to vector<32x128xf32>
    %9 = arith.maximumf %7, %8 : vector<32x128xf32>
    %10 = arith.truncf %9 : vector<32x128xf32> to vector<32x128xbf16>
    %c0_8 = arith.constant 0 : index
    %c0_9 = arith.constant 0 : index
    %c0_10 = arith.constant 0 : index
    %11 = vector.load %arg5[%c0_8, %c0_9, %c0_10] : memref<1x32x128xbf16, #tpu.memory_space<vmem>>, vector<1x32x128xbf16>
    %12 = vector.shape_cast %11 : vector<1x32x128xbf16> to vector<32x128xbf16>
    %13 = vector.shape_cast %10 : vector<32x128xbf16> to vector<1x32x128xbf16>
    tpu.vector_store %arg5[%c0_8, %c0_9, %c0_10], %13 {strides = array<i32>} : memref<1x32x128xbf16, #tpu.memory_space<vmem>>, vector<1x32x128xbf16>,
    return
  }
  func.func @transform_0(%arg0: i32, %arg1: i32) -> (i32, i32, i32) {
    %c0_i32 = arith.constant 0 : i32
    %c0_i32_0 = arith.constant 0 : i32
    return %arg0, %arg1, %c0_i32 : i32, i32, i32
  }
  func.func @transform_1(%arg0: i32, %arg1: i32) -> (i32, i32, i32) {
    %c0_i32 = arith.constant 0 : i32
    %c0_i32_0 = arith.constant 0 : i32
    %c0_i32_1 = arith.constant 0 : i32
    return %arg0, %c0_i32, %c0_i32_0 : i32, i32, i32
  }
  func.func @transform_2(%arg0: i32, %arg1: i32) -> (i32, i32) {
    %c0_i32 = arith.constant 0 : i32
    %c0_i32_0 = arith.constant 0 : i32
    %c0_i32_1 = arith.constant 0 : i32
    return %c0_i32, %c0_i32_0 : i32, i32
  }
  func.func @transform_3(%arg0: i32, %arg1: i32) -> (i32, i32, i32) {
    %c0_i32 = arith.constant 0 : i32
    %c0_i32_0 = arith.constant 0 : i32
    return %arg0, %arg1, %c0_i32 : i32, i32, i32
  }
}

module attributes {stable_mosaic.version = 11 : i64} {
  func.func @_phase_linear_kernel(%arg0: i32, %arg1: i32, %arg2: memref<1x64x64xbf16, #tpu.memory_space<vmem>>, %arg3: memref<1x64x128xbf16, #tpu.memory_space<vmem>>, %arg4: memref<1x128xf32, #tpu.memory_space<vmem>>, %arg5: memref<1x64x128xf32, #tpu.memory_space<vmem>>) attributes {dimension_semantics = [#tpu.dimension_semantics<parallel>, #tpu.dimension_semantics<parallel>], iteration_bounds = array<i64: 4, 2>, scalar_prefetch = 0 : i64, scratch_operands = 0 : i64, tpu.core_type = #tpu.core_type<tc>, window_params = [{transform_indices = @transform_0, window_bounds = array<i64: 1, 64, 64>}, {transform_indices = @transform_1, window_bounds = array<i64: 1, 64, 128>}, {pipeline_mode = #tpu.pipeline_mode<synchronous>, transform_indices = @transform_2, window_bounds = array<i64: 1, 128>}, {transform_indices = @transform_3, window_bounds = array<i64: 1, 64, 128>}]} {
    %c0 = arith.constant 0 : index
    %c0_0 = arith.constant 0 : index
    %c0_1 = arith.constant 0 : index
    %0 = vector.load %arg2[%c0, %c0_0, %c0_1] : memref<1x64x64xbf16, #tpu.memory_space<vmem>>, vector<1x64x64xbf16>
    %1 = vector.shape_cast %0 : vector<1x64x64xbf16> to vector<64x64xbf16>
    %c0_2 = arith.constant 0 : index
    %c0_3 = arith.constant 0 : index
    %c0_4 = arith.constant 0 : index
    %2 = vector.load %arg3[%c0_2, %c0_3, %c0_4] : memref<1x64x128xbf16, #tpu.memory_space<vmem>>, vector<1x64x128xbf16>
    %3 = vector.shape_cast %2 : vector<1x64x128xbf16> to vector<64x128xbf16>
    %cst = arith.constant dense<0.000000e+00> : vector<64x128xf32>
    %4 = tpu.matmul %1, %3, %cst {dimension_numbers = #tpu.dot_dimension_numbers<[1], [0], [0], [1], [0, 0, 1, 1], [], []>} : vector<64x64xbf16>, vector<64x128xbf16>, vector<64x128xf32> -> vector<64x128xf32>
    %c0_5 = arith.constant 0 : index
    %c0_6 = arith.constant 0 : index
    %5 = vector.load %arg4[%c0_5, %c0_6] : memref<1x128xf32, #tpu.memory_space<vmem>>, vector<1x128xf32>
    %6 = vector.broadcast %5 : vector<1x128xf32> to vector<64x128xf32>
    %7 = arith.addf %4, %6 : vector<64x128xf32>
    %c0_7 = arith.constant 0 : index
    %c0_8 = arith.constant 0 : index
    %c0_9 = arith.constant 0 : index
    %8 = vector.load %arg5[%c0_7, %c0_8, %c0_9] : memref<1x64x128xf32, #tpu.memory_space<vmem>>, vector<1x64x128xf32>
    %9 = vector.shape_cast %8 : vector<1x64x128xf32> to vector<64x128xf32>
    %10 = vector.shape_cast %7 : vector<64x128xf32> to vector<1x64x128xf32>
    tpu.vector_store %arg5[%c0_7, %c0_8, %c0_9], %10 {strides = array<i32>} : memref<1x64x128xf32, #tpu.memory_space<vmem>>, vector<1x64x128xf32>,
    return
  }
  func.func @transform_0(%arg0: i32, %arg1: i32) -> (i32, i32, i32) {
    %c0_i32 = arith.constant 0 : i32
    %c0_i32_0 = arith.constant 0 : i32
    return %arg0, %arg1, %c0_i32 : i32, i32, i32
  }
  func.func @transform_1(%arg0: i32, %arg1: i32) -> (i32, i32, i32) {
    %c0_i32 = arith.constant 0 : i32
    %c0_i32_0 = arith.constant 0 : i32
    %c0_i32_1 = arith.constant 0 : i32
    return %arg0, %c0_i32, %c0_i32_0 : i32, i32, i32
  }
  func.func @transform_2(%arg0: i32, %arg1: i32) -> (i32, i32) {
    %c0_i32 = arith.constant 0 : i32
    %c0_i32_0 = arith.constant 0 : i32
    %c0_i32_1 = arith.constant 0 : i32
    return %c0_i32, %c0_i32_0 : i32, i32
  }
  func.func @transform_3(%arg0: i32, %arg1: i32) -> (i32, i32, i32) {
    %c0_i32 = arith.constant 0 : i32
    %c0_i32_0 = arith.constant 0 : i32
    return %arg0, %arg1, %c0_i32 : i32, i32, i32
  }
}

</mosaic_0001>

<bundles_post_ra>
// kernel: vq_vae_forward.9
= control target key start
LH: loop header
LB: loop body
LE: loop exit
PB: predicated region body
PF: predicated region fallthrough
CT: control target
= control target key end

     0   :  { %s727_s12 = smov 0   ;;  %s809_s0 = inlined_call_operand.vmem [shape: bf16[128,256], index: 0, kind: input, shape index: {}]   ;;  %s810_s1 = inlined_call_operand.vmem [shape: bf16[256,128], index: 1, kind: input, shape index: {}]   ;;  %s811_s2 = inlined_call_operand.vmem [shape: f32[1,128], index: 2, kind: input, shape index: {}]   ;;  %s812_s3 = inlined_call_operand.vmem [shape: bf16[128,128], index: 3, kind: output, shape index: {}]  }
   0x1 LB: > { %s530_s13 = sadd.s32 4294967295, %s705_s12   ;;  %p534_p0 = scmp.ge.s32.totalorder %s705_s12, 1  ;;  %s705_s12 = sphi %s727_s12, %s13_s12  }
   0x2   : > { %p139_p1 = scmp.lt.s32.totalorder %s705_s12, 3 }
   0x4   : > { %p140_p2 = pnand %p534_p0, %p139_p1 }
   0x5   : > { %v671_v0 = vld [vmem:[%s810_s1 + $0x40] sm:$0xff] (!%p140_p2)   ;;  %s535_s16 = sshll.u32 (!%p140_p2), %s530_s13, 3  ;;  %v673_v2 = vld [vmem:[%s810_s1 + $0x48] sm:$0xff] (!%p140_p2)   ;;  %v675_v4 = vld [vmem:[%s810_s1 + $0x50] sm:$0xff] (!%p140_p2)  }
   0x6   : > { %143 = sbr.rel (%p140_p2) target bundleno = 271 (0x10f), region = 32  ;;  %v672_v1 = vld [vmem:[%s810_s1] sm:$0xff] (!%p140_p2)   ;;  %607 = vmatprep.subr.bf16.mxu0 (!%p140_p2), %v671_v0  ;;  %647 = vmatprep.subr.bf16.mxu1 (!%p140_p2), %v671_v0  ;;  %v674_v3 = vld [vmem:[%s810_s1 + $0x8] sm:$0xff] (!%p140_p2)   ;;  %p165_p3 = scmp.lt.s32.totalorder (!%p140_p2), %s535_s16, 15  ;;  %v676_v5 = vld [vmem:[%s810_s1 + $0x10] sm:$0xff] (!%p140_p2)  }
   0x7   : > { %608 = vmatpush3.bf16.msra.mxu0 (!%p140_p2), %v672_v1  ;;  %655 = vmatpush3.bf16.msra.mxu1 (!%p140_p2), %v672_v1  ;;  %v677_v6 = vld [vmem:[%s810_s1 + $0x58] sm:$0xff] (!%p140_p2)   ;;  %v679_v8 = vld [vmem:[%s810_s1 + $0x60] sm:$0xff] (!%p140_p2)   ;;  %v681_v10 = vld [vmem:[%s810_s1 + $0x68] sm:$0xff] (!%p140_p2)  }
   0x8   : > { %609 = vmatprep.subr.bf16.mxu0 (!%p140_p2), %v673_v2  ;;  %648 = vmatprep.subr.bf16.mxu1 (!%p140_p2), %v673_v2  ;;  %v678_v7 = vld [vmem:[%s810_s1 + $0x18] sm:$0xff] (!%p140_p2)   ;;  %v680_v9 = vld [vmem:[%s810_s1 + $0x20] sm:$0xff] (!%p140_p2)   ;;  %v682_v13 = vld [vmem:[%s810_s1 + $0x28] sm:$0xff] (!%p140_p2)  }
   0x9   : > { %v683_v14 = vld [vmem:[%s810_s1 + $0x70] sm:$0xff] (!%p140_p2)   ;;  %v685_v16 = vld [vmem:[%s810_s1 + $0x78] sm:$0xff] (!%p140_p2)   ;;  %v540_v26 = vld [vmem:[%s811_s2] ss:$0 sm:$0xff] (!%p140_p2) }
   0xa   : > { %v684_v15 = vld [vmem:[%s810_s1 + $0x30] sm:$0xff] (!%p140_p2)   ;;  %v686_v17 = vld [vmem:[%s810_s1 + $0x38] sm:$0xff] (!%p140_p2)  }
   0xb   : > { %610 = vmatpush3.bf16.msra.mxu0 (!%p140_p2), %v674_v3  ;;  %656 = vmatpush3.bf16.msra.mxu1 (!%p140_p2), %v674_v3 }
   0xc   : > { %611 = vmatprep.subr.bf16.mxu0 (!%p140_p2), %v675_v4  ;;  %649 = vmatprep.subr.bf16.mxu1 (!%p140_p2), %v675_v4 }
   0xd   : > { %s814_s16 = smov (!%p165_p3, %s535_s16), 15 }
   0xe   : > { %s575_s4 = sshll.u32 %s814_s16, 3  ;;  %s539_s28 = sshll.u32 %s814_s16, 2 }
   0xf   : > { %612 = vmatpush3.bf16.msra.mxu0 %v676_v5  ;;  %657 = vmatpush3.bf16.msra.mxu1 %v676_v5  ;;  %s768_s9 = scalar_lea.vmem %s809_s0, %s575_s4  ;;  %s175_s4 = scalar_lea.vmem %s812_s3, %s539_s28 }
  0x10   : > { %613 = vmatprep.subr.bf16.mxu0 %v677_v6  ;;  %650 = vmatprep.subr.bf16.mxu1 %v677_v6  ;;  %v689_v11 = vld [vmem:[%s768_s9 + $0x4] ss:$8 sps:$4 sm:$0xff]   ;;  %v687_v18 = vld [vmem:[%s768_s9] ss:$8 sps:$4 sm:$0xff]   ;;  %v693_v20 = vld [vmem:[%s768_s9 + $0x14] ss:$8 sps:$4 sm:$0xff]  }
  0x11   : > { %v692_v12 = vld [vmem:[%s768_s9 + $0x24] ss:$8 sps:$4 sm:$0xff]   ;;  %393 = vmatprep.mubr.bf16.mxu0 %v689_v11  ;;  %v690_v19 = vld [vmem:[%s768_s9 + $0x20] ss:$8 sps:$4 sm:$0xff]   ;;  %v695_v21 = vld [vmem:[%s768_s9 + $0x34] ss:$8 sps:$4 sm:$0xff]  }
  0x12   : > { %409 = vmatprep.mubr.bf16.mxu1 %v692_v12  ;;  %v697_v22 = vld [vmem:[%s768_s9 + $0x10] ss:$8 sps:$4 sm:$0xff]  }
  0x13   : > { %614 = vmatpush3.bf16.msra.mxu0 %v678_v7  ;;  %658 = vmatpush3.bf16.msra.mxu1 %v678_v7  ;;  %v698_v23 = vld [vmem:[%s768_s9 + $0x30] ss:$8 sps:$4 sm:$0xff]  }
  0x14   : > { %615 = vmatprep.subr.bf16.mxu0 %v679_v8  ;;  %651 = vmatprep.subr.bf16.mxu1 %v679_v8 }
  0x17   : > { %616 = vmatpush3.bf16.msra.mxu0 %v680_v9  ;;  %659 = vmatpush3.bf16.msra.mxu1 %v680_v9 }
  0x18   : > { %617 = vmatprep.subr.bf16.mxu0 %v681_v10  ;;  %652 = vmatprep.subr.bf16.mxu1 %v681_v10 }
  0x1b   : > { %618 = vmatpush3.bf16.msra.mxu0 %v682_v13  ;;  %660 = vmatpush3.bf16.msra.mxu1 %v682_v13 }
  0x1c   : > { %619 = vmatprep.subr.bf16.mxu0 %v683_v14  ;;  %653 = vmatprep.subr.bf16.mxu1 %v683_v14 }
  0x1f   : > { %620 = vmatpush3.bf16.msra.mxu0 %v684_v15  ;;  %661 = vmatpush3.bf16.msra.mxu1 %v684_v15 }
  0x20   : > { %621 = vmatprep.subr.bf16.mxu0 %v685_v16  ;;  %654 = vmatprep.subr.bf16.mxu1 %v685_v16 }
  0x23   : > { %622 = vmatpush3.bf16.msra.mxu0 %v686_v17  ;;  %662 = vmatpush3.bf16.msra.mxu1 %v686_v17 }
  0x26   : > { %394 = vmatmul.mubr.bf16.vlgmr.msra.gmra.mrb[0].mxu0 %v687_v18  ;;  %410 = vmatmul.mubr.bf16.vlgmr.msra.gmra.mrb[0].mxu1 %v690_v19 }
  0x27   : > { %401 = vmatprep.mubr.bf16.mxu0 %v693_v20  ;;  %417 = vmatprep.mubr.bf16.mxu1 %v695_v21 }
  0x2e   : > { %402 = vmatmul.mubr.bf16.gmra.mrb[4].mxu0 %v697_v22  ;;  %418 = vmatmul.mubr.bf16.gmra.mrb[4].mxu1 %v698_v23 }
  0xf9   : > { %v623_v24 = vpop.f32.mrb[0].mxu0  ;;  %v635_v25 = vpop.f32.mrb[0].mxu1 }
  0xfa   : > { %v624_v27 = vpop.f32.mrb[1].mxu0  ;;  %v636_v28 = vpop.f32.mrb[1].mxu1 }
  0xfb   : > { %v625_v29 = vadd.f32 %v624_v27, %v623_v24  ;;  %v637_v30 = vadd.f32 %v636_v28, %v635_v25  ;;  %v626_v31 = vpop.f32.mrb[2].mxu0  ;;  %v638_v32 = vpop.f32.mrb[2].mxu1 }
  0xfc   : > { %v627_v33 = vpop.f32.mrb[3].mxu0  ;;  %v639_v34 = vpop.f32.mrb[3].mxu1 }
  0xfd   : > { %v396_v35 = vadd.f32 %v625_v29, %v540_v26  ;;  %v412_v36 = vadd.f32 %v637_v30, %v540_v26  ;;  %v628_v37 = vadd.f32 %v627_v33, %v626_v31  ;;  %v640_v38 = vadd.f32 %v639_v34, %v638_v32 }
  0xff   : > { %v399_v39 = vadd.f32 %v628_v37, %v540_v26  ;;  %v415_v40 = vadd.f32 %v640_v38, %v540_v26  ;;  %v426_v41 = vmax.f32 %v396_v35, 0.0  ;;  %v430_v42 = vmax.f32 %v412_v36, 0.0 }
 0x101   : > { %v427_v43 = vmax.f32 %v399_v39, 0.0  ;;  %v431_v44 = vmax.f32 %v415_v40, 0.0  ;;  %v629_v45 = vpop.f32.mrb[4].mxu0  ;;  %v641_v46 = vpop.f32.mrb[4].mxu1 }
 0x102   : > { %v630_v47 = vpop.f32.mrb[5].mxu0  ;;  %v642_v48 = vpop.f32.mrb[5].mxu1 }
 0x103   : > { %v587_v49 = vpack.c.bf16 %v427_v43, %v426_v41  ;;  %v597_v50 = vpack.c.bf16 %v431_v44, %v430_v42  ;;  %v631_v51 = vadd.f32 %v630_v47, %v629_v45  ;;  %v643_v52 = vadd.f32 %v642_v48, %v641_v46  ;;  %v632_v53 = vpop.f32.mrb[6].mxu0  ;;  %v644_v54 = vpop.f32.mrb[6].mxu1 }
 0x104   : > { %v633_v55 = vpop.f32.mrb[7].mxu0  ;;  %v645_v56 = vpop.f32.mrb[7].mxu1 }
 0x105   : > { %588 = vst [vmem:[%s175_s4] sm:$0xff] %v587_v49   ;;  %605 = vst [vmem:[%s175_s4 + $0x10] sm:$0xff] %v597_v50   ;;  %v404_v57 = vadd.f32 %v631_v51, %v540_v26  ;;  %v420_v58 = vadd.f32 %v643_v52, %v540_v26  ;;  %v634_v59 = vadd.f32 %v633_v55, %v632_v53 }
 0x106   : > { %v646_v60 = vadd.f32 %v645_v56, %v644_v54 }
 0x107   : > { %v407_v61 = vadd.f32 %v634_v59, %v540_v26  ;;  %v428_v63 = vmax.f32 %v404_v57, 0.0  ;;  %v432_v0 = vmax.f32 %v420_v58, 0.0 }
 0x108   : > { %v423_v62 = vadd.f32 %v646_v60, %v540_v26 }
 0x109   : > { %v429_v1 = vmax.f32 %v407_v61, 0.0 }
 0x10a   : > { %v433_v2 = vmax.f32 %v423_v62, 0.0 }
 0x10b   : > { %v592_v3 = vpack.c.bf16 %v429_v1, %v428_v63 }
 0x10c   : > { %v602_v4 = vpack.c.bf16 %v433_v2, %v432_v0 }
 0x10d   : > { %604 = vst [vmem:[%s175_s4 + $0x8] sm:$0xff] %v592_v3  }
 0x10e   : > { %606 = vst [vmem:[%s175_s4 + $0x18] sm:$0xff] %v602_v4  }
 0x10f PF: > { %s13_s12 = sadd.s32 1, %s705_s12  }
 0x110   : > { %p10_p4 = scmp.ge.s32.totalorder %s13_s12, 4  }
 0x112   :  { %12 = sbr.rel (!%p10_p4) target bundleno = 1 (0x1), region = 62 }

// kernel: vq_vae_forward.10
= control target key start
LH: loop header
LB: loop body
LE: loop exit
PB: predicated region body
PF: predicated region fallthrough
CT: control target
= control target key end

     0   :  { %s442_s1 = inlined_call_operand.vmem [shape: bf16[256,128], index: 1, kind: input, shape index: {}]   ;;  %s443_s0 = inlined_call_operand.vmem [shape: bf16[32,256], index: 0, kind: input, shape index: {}]   ;;  %s444_s2 = inlined_call_operand.vmem [shape: f32[1,128], index: 2, kind: input, shape index: {}]   ;;  %s445_s3 = inlined_call_operand.vmem [shape: bf16[32,128], index: 3, kind: output, shape index: {}]  }
   0x1   :  { %v331_v0 = vld [vmem:[%s442_s1 + $0x40] sm:$0xff]   ;;  %v333_v2 = vld [vmem:[%s442_s1 + $0x48] sm:$0xff]   ;;  %v335_v4 = vld [vmem:[%s442_s1 + $0x50] sm:$0xff]  }
   0x2   :  { %v332_v1 = vld [vmem:[%s442_s1] sm:$0xff]   ;;  %287 = vmatprep.subr.bf16.mxu0 %v331_v0  ;;  %315 = vmatprep.subr.bf16.mxu1 %v331_v0  ;;  %v334_v3 = vld [vmem:[%s442_s1 + $0x8] sm:$0xff]   ;;  %v336_v5 = vld [vmem:[%s442_s1 + $0x10] sm:$0xff]  }
   0x3   :  { %288 = vmatpush3.bf16.msra.mxu0 %v332_v1  ;;  %323 = vmatpush3.bf16.msra.mxu1 %v332_v1  ;;  %v337_v6 = vld [vmem:[%s442_s1 + $0x58] sm:$0xff]   ;;  %v339_v8 = vld [vmem:[%s442_s1 + $0x60] sm:$0xff]   ;;  %v341_v10 = vld [vmem:[%s442_s1 + $0x68] sm:$0xff]  }
   0x4   :  { %289 = vmatprep.subr.bf16.mxu0 %v333_v2  ;;  %316 = vmatprep.subr.bf16.mxu1 %v333_v2  ;;  %v338_v7 = vld [vmem:[%s442_s1 + $0x18] sm:$0xff]   ;;  %v340_v9 = vld [vmem:[%s442_s1 + $0x20] sm:$0xff]   ;;  %v342_v13 = vld [vmem:[%s442_s1 + $0x28] sm:$0xff]  }
   0x5   :  { %v349_v11 = vld [vmem:[%s443_s0 + $0x4] ss:$8 sps:$4 sm:$0xff]   ;;  %v352_v12 = vld [vmem:[%s443_s0 + $0x14] ss:$8 sps:$4 sm:$0xff]   ;;  %v347_v18 = vld [vmem:[%s443_s0] ss:$8 sps:$4 sm:$0xff]  }
   0x6   :  { %v343_v14 = vld [vmem:[%s442_s1 + $0x70] sm:$0xff]   ;;  %206 = vmatprep.mubr.bf16.mxu0 %v349_v11  ;;  %214 = vmatprep.mubr.bf16.mxu1 %v352_v12  ;;  %v345_v16 = vld [vmem:[%s442_s1 + $0x78] sm:$0xff]   ;;  %v247_v28 = vld [vmem:[%s444_s2] ss:$0 sm:$0xff] }
   0x7   :  { %290 = vmatpush3.bf16.msra.mxu0 %v334_v3  ;;  %324 = vmatpush3.bf16.msra.mxu1 %v334_v3  ;;  %v344_v15 = vld [vmem:[%s442_s1 + $0x30] sm:$0xff]   ;;  %v346_v17 = vld [vmem:[%s442_s1 + $0x38] sm:$0xff]  }
   0x8   :  { %291 = vmatprep.subr.bf16.mxu0 %v335_v4  ;;  %317 = vmatprep.subr.bf16.mxu1 %v335_v4  ;;  %v350_v19 = vld [vmem:[%s443_s0 + $0x10] ss:$8 sps:$4 sm:$0xff]  }
   0xb   :  { %292 = vmatpush3.bf16.msra.mxu0 %v336_v5  ;;  %325 = vmatpush3.bf16.msra.mxu1 %v336_v5 }
   0xc   :  { %293 = vmatprep.subr.bf16.mxu0 %v337_v6  ;;  %318 = vmatprep.subr.bf16.mxu1 %v337_v6 }
   0xf   :  { %294 = vmatpush3.bf16.msra.mxu0 %v338_v7  ;;  %326 = vmatpush3.bf16.msra.mxu1 %v338_v7 }
  0x10   :  { %295 = vmatprep.subr.bf16.mxu0 %v339_v8  ;;  %319 = vmatprep.subr.bf16.mxu1 %v339_v8 }
  0x13   :  { %296 = vmatpush3.bf16.msra.mxu0 %v340_v9  ;;  %327 = vmatpush3.bf16.msra.mxu1 %v340_v9 }
  0x14   :  { %297 = vmatprep.subr.bf16.mxu0 %v341_v10  ;;  %320 = vmatprep.subr.bf16.mxu1 %v341_v10 }
  0x17   :  { %298 = vmatpush3.bf16.msra.mxu0 %v342_v13  ;;  %328 = vmatpush3.bf16.msra.mxu1 %v342_v13 }
  0x18   :  { %299 = vmatprep.subr.bf16.mxu0 %v343_v14  ;;  %321 = vmatprep.subr.bf16.mxu1 %v343_v14 }
  0x1b   :  { %300 = vmatpush3.bf16.msra.mxu0 %v344_v15  ;;  %329 = vmatpush3.bf16.msra.mxu1 %v344_v15 }
  0x1c   :  { %301 = vmatprep.subr.bf16.mxu0 %v345_v16  ;;  %322 = vmatprep.subr.bf16.mxu1 %v345_v16 }
  0x1f   :  { %302 = vmatpush3.bf16.msra.mxu0 %v346_v17  ;;  %330 = vmatpush3.bf16.msra.mxu1 %v346_v17 }
  0x22   :  { %207 = vmatmul.mubr.bf16.vlgmr.msra.gmra.mrb[0].mxu0 %v347_v18  ;;  %215 = vmatmul.mubr.bf16.vlgmr.msra.gmra.mrb[0].mxu1 %v350_v19 }
  0xf5   :  { %v303_v20 = vpop.f32.mrb[0].mxu0  ;;  %v309_v21 = vpop.f32.mrb[0].mxu1 }
  0xf6   :  { %v304_v22 = vpop.f32.mrb[1].mxu0  ;;  %v310_v23 = vpop.f32.mrb[1].mxu1 }
  0xf7   :  { %v305_v24 = vadd.f32 %v304_v22, %v303_v20  ;;  %v311_v25 = vadd.f32 %v310_v23, %v309_v21  ;;  %v306_v26 = vpop.f32.mrb[2].mxu0  ;;  %v312_v27 = vpop.f32.mrb[2].mxu1 }
  0xf8   :  { %v307_v29 = vpop.f32.mrb[3].mxu0  ;;  %v313_v30 = vpop.f32.mrb[3].mxu1 }
  0xf9   :  { %v308_v31 = vadd.f32 %v307_v29, %v306_v26  ;;  %v314_v32 = vadd.f32 %v313_v30, %v312_v27  ;;  %v209_v33 = vadd.f32 %v305_v24, %v247_v28  ;;  %v217_v34 = vadd.f32 %v311_v25, %v247_v28 }
  0xfb   :  { %v212_v35 = vadd.f32 %v308_v31, %v247_v28  ;;  %v220_v36 = vadd.f32 %v314_v32, %v247_v28 }
  0xfd   :  { %v279_v37 = vpack.c.bf16 %v212_v35, %v209_v33  ;;  %v284_v38 = vpack.c.bf16 %v220_v36, %v217_v34 }
  0xff   :  { %280 = vst [vmem:[%s445_s3] sm:$0xff] %v279_v37   ;;  %286 = vst [vmem:[%s445_s3 + $0x8] sm:$0xff] %v284_v38  }

// kernel: vq_vae_forward.11
= control target key start
LH: loop header
LB: loop body
LE: loop exit
PB: predicated region body
PF: predicated region fallthrough
CT: control target
= control target key end

     0   :  { %v450_v0 = vmov 0   ;;  %vm125_vm0 = vcmask 130048   ;;  %s569_s1 = inlined_call_operand.vmem [shape: bf16[144,128], index: 1, kind: input, shape index: {}]   ;;  %s570_s0 = inlined_call_operand.vmem [shape: bf16[32,144], index: 0, kind: input, shape index: {}]   ;;  %s571_s3 = inlined_call_operand.vmem [shape: bf16[128,128], index: 3, kind: input, shape index: {}]   ;;  %s572_s2 = inlined_call_operand.vmem [shape: f32[1,128], index: 2, kind: input, shape index: {}, may-alias: {2,4}]   ;;  %s573_s4 = inlined_call_operand.vmem [shape: f32[1,128], index: 4, kind: input, shape index: {}, may-alias: {2,4}]   ;;  %s574_s5 = inlined_call_operand.vmem [shape: bf16[32,128], index: 5, kind: input, shape index: {}]   ;;  %s575_s6 = inlined_call_operand.vmem [shape: bf16[32,128], index: 6, kind: output, shape index: {}]  }
   0x1   :  { %132 = vmatprep.subr.bf16.mxu0 %v450_v0  ;;  %v427_v1 = vld [vmem:[%s569_s1] sm:$0xff]   ;;  %v428_v2 = vld [vmem:[%s569_s1 + $0x8] sm:$0xff]   ;;  %v429_v3 = vld [vmem:[%s569_s1 + $0x10] sm:$0xff]  }
   0x2   :  { %133 = vmatpush1.bf16.msra.mxu0 %v427_v1  ;;  %v430_v4 = vld [vmem:[%s569_s1 + $0x18] sm:$0xff]   ;;  %v438_v5 = vld [vmem:[%s570_s0 + $0x4] ss:$8 sps:$4 sm:$0xff]   ;;  %v444_v9 = vld [vmem:[%s571_s3 + $0x10] sm:$0xff]  }
   0x3   :  { %134 = vmatprep.subr.bf16.mxu0 %v450_v0  ;;  %357 = vmatprep.mubr.msk.bf16.mxu0 %vm125_vm0, %v438_v5  ;;  %v442_v6 = vld [vmem:[%s571_s3] sm:$0xff]   ;;  %v443_v7 = vld [vmem:[%s571_s3 + $0x8] sm:$0xff]   ;;  %v445_v11 = vld [vmem:[%s571_s3 + $0x18] sm:$0xff]  }
   0x4   :  { %v431_v8 = vld [vmem:[%s569_s1 + $0x20] sm:$0xff]   ;;  %406 = vmatprep.subr.bf16.mxu1 %v442_v6  ;;  %v432_v10 = vld [vmem:[%s569_s1 + $0x28] sm:$0xff]   ;;  %v433_v12 = vld [vmem:[%s569_s1 + $0x30] sm:$0xff]  }
   0x5   :  { %407 = vmatpush3.bf16.msra.mxu1 %v442_v6  ;;  %v434_v13 = vld [vmem:[%s569_s1 + $0x38] sm:$0xff]   ;;  %v435_v14 = vld [vmem:[%s569_s1 + $0x40] sm:$0xff]   ;;  %v447_v19 = vld [vmem:[%s571_s3 + $0x28] sm:$0xff]  }
   0x6   :  { %135 = vmatpush1.bf16.msra.mxu0 %v428_v2  ;;  %408 = vmatprep.subr.bf16.mxu1 %v443_v7  ;;  %v436_v15 = vld [vmem:[%s570_s0] ss:$8 sps:$4 sm:$0xff]   ;;  %v439_v16 = vld [vmem:[%s570_s0 + $0x14] ss:$8 sps:$4 sm:$0xff]   ;;  %v441_v17 = vld [vmem:[%s570_s0 + $0x10] ss:$8 sps:$4 sm:$0xff]  }
   0x7   :  { %136 = vmatprep.subr.bf16.mxu0 %v450_v0  ;;  %v446_v18 = vld [vmem:[%s571_s3 + $0x20] sm:$0xff]   ;;  %v448_v20 = vld [vmem:[%s571_s3 + $0x30] sm:$0xff]   ;;  %v449_v21 = vld [vmem:[%s571_s3 + $0x38] sm:$0xff]  }
   0x8   :  { %v343_v22 = vld [vmem:[%s572_s2] ss:$0 sm:$0xff]  ;;  %v394_v42 = vld [vmem:[%s574_s5 + $0x8] sm:$0xff]  }
   0x9   :  { %409 = vmatpush3.bf16.msra.mxu1 %v443_v7  ;;  %v359_v41 = vld [vmem:[%s573_s4] ss:$0 sm:$0xff]  ;;  %v382_v46 = vunpack.c.l.bf16 %v394_v42  ;;  %v383_v48 = vunpack.c.h.bf16 %v394_v42 }
   0xa   :  { %137 = vmatpush1.bf16.msra.mxu0 %v429_v3  ;;  %410 = vmatprep.subr.bf16.mxu1 %v444_v9  ;;  %v377_v43 = vld [vmem:[%s574_s5] sm:$0xff]  }
   0xb   :  { %138 = vmatprep.subr.bf16.mxu0 %v450_v0  ;;  %v378_v50 = vunpack.c.l.bf16 %v377_v43  ;;  %v379_v52 = vunpack.c.h.bf16 %v377_v43 }
   0xd   :  { %411 = vmatpush3.bf16.msra.mxu1 %v444_v9 }
   0xe   :  { %139 = vmatpush1.bf16.msra.mxu0 %v430_v4  ;;  %412 = vmatprep.subr.bf16.mxu1 %v445_v11 }
   0xf   :  { %140 = vmatprep.subr.bf16.mxu0 %v450_v0 }
  0x11   :  { %413 = vmatpush3.bf16.msra.mxu1 %v445_v11 }
  0x12   :  { %141 = vmatpush1.bf16.msra.mxu0 %v431_v8  ;;  %414 = vmatprep.subr.bf16.mxu1 %v446_v18 }
  0x13   :  { %142 = vmatprep.subr.bf16.mxu0 %v450_v0 }
  0x15   :  { %415 = vmatpush3.bf16.msra.mxu1 %v446_v18 }
  0x16   :  { %143 = vmatpush1.bf16.msra.mxu0 %v432_v10  ;;  %416 = vmatprep.subr.bf16.mxu1 %v447_v19 }
  0x17   :  { %144 = vmatprep.subr.bf16.mxu0 %v450_v0 }
  0x19   :  { %417 = vmatpush3.bf16.msra.mxu1 %v447_v19 }
  0x1a   :  { %145 = vmatpush1.bf16.msra.mxu0 %v433_v12  ;;  %418 = vmatprep.subr.bf16.mxu1 %v448_v20 }
  0x1b   :  { %146 = vmatprep.subr.bf16.mxu0 %v450_v0 }
  0x1d   :  { %419 = vmatpush3.bf16.msra.mxu1 %v448_v20 }
  0x1e   :  { %147 = vmatpush1.bf16.msra.mxu0 %v434_v13  ;;  %420 = vmatprep.subr.bf16.mxu1 %v449_v21 }
  0x1f   :  { %148 = vmatprep.subr.bf16.mxu0 %v450_v0 }
  0x21   :  { %421 = vmatpush3.bf16.msra.mxu1 %v449_v21 }
  0x22   :  { %149 = vmatpush1.bf16.msra.mxu0 %v435_v14 }
  0x25   :  { %165 = vmatmul.mubr.bf16.vlgmr.msra.gmra.mrb[0].mxu0 %v436_v15 }
  0x26   :  { %358 = vmatprep.mubr.msk.bf16.mxu0 %vm125_vm0, %v439_v16 }
  0x2d   :  { %173 = vmatmul.mubr.bf16.gmra.mrb[4].mxu0 %v441_v17 }
  0xf8   :  { %v166_v23 = vpop.f32.mrb[0].mxu0 }
  0xf9   :  { %v167_v24 = vadd.f32 %v343_v22, %v166_v23  ;;  %v168_v25 = vpop.f32.mrb[1].mxu0 }
  0xfa   :  { %v169_v26 = vpop.f32.mrb[2].mxu0 }
  0xfb   :  { %v170_v27 = vadd.f32 %v343_v22, %v169_v26  ;;  %v171_v28 = vpop.f32.mrb[3].mxu0  ;;  %v181_v29 = vmax.f32 %v167_v24, 0.0 }
  0xfd   :  { %v182_v30 = vmax.f32 %v170_v27, 0.0 }
  0xff   :  { %v185_v31 = vpack.c.bf16 %v182_v30, %v181_v29 }
 0x100   :  { %v174_v32 = vpop.f32.mrb[4].mxu0 }
 0x101   :  { %v175_v33 = vadd.f32 %v343_v22, %v174_v32  ;;  %v176_v34 = vpop.f32.mrb[5].mxu0  ;;  %422 = vmatprep.mubr.bf16.mxu1 %v185_v31 }
 0x102   :  { %v177_v35 = vpop.f32.mrb[6].mxu0 }
 0x103   :  { %v178_v36 = vadd.f32 %v343_v22, %v177_v35  ;;  %v179_v37 = vpop.f32.mrb[7].mxu0  ;;  %v183_v38 = vmax.f32 %v175_v33, 0.0 }
 0x105   :  { %v184_v39 = vmax.f32 %v178_v36, 0.0 }
 0x107   :  { %v186_v40 = vpack.c.bf16 %v184_v39, %v183_v38 }
 0x109   :  { %423 = vmatmul.mubr.bf16.vlgmr.msra.gmra.mrb[0].mxu1 %v186_v40 }
 0x1dc   :  { %v424_v44 = vpop.f32.mrb[0].mxu1 }
 0x1dd   :  { %v301_v45 = vadd.f32 %v424_v44, %v359_v41  ;;  %v292_v47 = vpop.f32.mrb[1].mxu1 }
 0x1de   :  { %v293_v49 = vadd.f32 %v359_v41, %v292_v47  ;;  %v425_v51 = vpop.f32.mrb[2].mxu1 }
 0x1df   :  { %v304_v53 = vadd.f32 %v425_v51, %v359_v41  ;;  %v295_v54 = vpop.f32.mrb[3].mxu1  ;;  %v317_v56 = vadd.f32 %v382_v46, %v301_v45 }
 0x1e0   :  { %v296_v55 = vadd.f32 %v359_v41, %v295_v54  ;;  %v315_v58 = vadd.f32 %v378_v50, %v293_v49 }
 0x1e1   :  { %v318_v57 = vadd.f32 %v383_v48, %v304_v53 }
 0x1e2   :  { %v316_v59 = vadd.f32 %v379_v52, %v296_v55 }
 0x1e3   :  { %v392_v60 = vpack.c.bf16 %v318_v57, %v317_v56 }
 0x1e4   :  { %v387_v61 = vpack.c.bf16 %v316_v59, %v315_v58 }
 0x1e5   :  { %395 = vst [vmem:[%s575_s6 + $0x8] sm:$0xff] %v392_v60  }
 0x1e6   :  { %388 = vst [vmem:[%s575_s6] sm:$0xff] %v387_v61  }

// kernel: vq_vae_forward.13
= control target key start
LH: loop header
LB: loop body
LE: loop exit
PB: predicated region body
PF: predicated region fallthrough
CT: control target
= control target key end

     0   :  { %v159_v23 = vlaneseq  ;;  %s499_s1 = inlined_call_operand.vmem [shape: bf16[128,128], index: 1, kind: input, shape index: {}]   ;;  %s500_s0 = inlined_call_operand.vmem [shape: bf16[32,128], index: 0, kind: input, shape index: {}]   ;;  %s501_s2 = inlined_call_operand.vmem [shape: f32[1,128], index: 2, kind: input, shape index: {}]   ;;  %s502_s3 = inlined_call_operand.vmem [shape: bf16[32,128], index: 3, kind: output, shape index: {}]  }
   0x1   :  { %v419_v0 = vld [vmem:[%s499_s1] sm:$0xff]   ;;  %v420_v1 = vld [vmem:[%s499_s1 + $0x8] sm:$0xff]   ;;  %v421_v2 = vld [vmem:[%s499_s1 + $0x10] sm:$0xff]  }
   0x2   :  { %378 = vmatprep.subr.bf16.mxu0 %v419_v0  ;;  %398 = vmatprep.subr.bf16.mxu1 %v419_v0  ;;  %v427_v3 = vld [vmem:[%s500_s0] sm:$0xff]   ;;  %v422_v4 = vld [vmem:[%s499_s1 + $0x18] sm:$0xff]   ;;  %v424_v6 = vld [vmem:[%s499_s1 + $0x28] sm:$0xff]   ;;  %v483_v24 = vand.u32 127, %v159_v23 }
   0x3   :  { %379 = vmatpush3.bf16.xpose.msra.mxu0 %v419_v0  ;;  %399 = vmatpush3.bf16.msra.mxu1 %v419_v0  ;;  %v423_v5 = vld [vmem:[%s499_s1 + $0x20] sm:$0xff]   ;;  %v425_v7 = vld [vmem:[%s499_s1 + $0x30] sm:$0xff]   ;;  %v426_v8 = vld [vmem:[%s499_s1 + $0x38] sm:$0xff]  }
   0x4   :  { %380 = vmatprep.subr.bf16.mxu0 %v420_v1  ;;  %400 = vmatprep.subr.bf16.mxu1 %v420_v1  ;;  %v428_v9 = vld [vmem:[%s500_s0 + $0x8] sm:$0xff]   ;;  %v330_v11 = vld [vmem:[%s501_s2] ss:$0 sm:$0xff] }
   0x5   :  { %394 = vmatprep.mubr.bf16.mxu0 %v427_v3 }
   0x7   :  { %401 = vmatpush3.bf16.msra.mxu1 %v420_v1 }
   0x8   :  { %402 = vmatprep.subr.bf16.mxu1 %v421_v2 }
   0xb   :  { %381 = vmatpush3.bf16.xpose.msra.mxu0 %v420_v1  ;;  %403 = vmatpush3.bf16.msra.mxu1 %v421_v2 }
   0xc   :  { %382 = vmatprep.subr.bf16.mxu0 %v421_v2  ;;  %404 = vmatprep.subr.bf16.mxu1 %v422_v4 }
   0xf   :  { %405 = vmatpush3.bf16.msra.mxu1 %v422_v4 }
  0x10   :  { %406 = vmatprep.subr.bf16.mxu1 %v423_v5 }
  0x13   :  { %383 = vmatpush3.bf16.xpose.msra.mxu0 %v421_v2  ;;  %407 = vmatpush3.bf16.msra.mxu1 %v423_v5 }
  0x14   :  { %384 = vmatprep.subr.bf16.mxu0 %v422_v4  ;;  %408 = vmatprep.subr.bf16.mxu1 %v424_v6 }
  0x17   :  { %409 = vmatpush3.bf16.msra.mxu1 %v424_v6 }
  0x18   :  { %410 = vmatprep.subr.bf16.mxu1 %v425_v7 }
  0x1b   :  { %385 = vmatpush3.bf16.xpose.msra.mxu0 %v422_v4  ;;  %411 = vmatpush3.bf16.msra.mxu1 %v425_v7 }
  0x1c   :  { %386 = vmatprep.subr.bf16.mxu0 %v423_v5  ;;  %412 = vmatprep.subr.bf16.mxu1 %v426_v8 }
  0x1f   :  { %413 = vmatpush3.bf16.msra.mxu1 %v426_v8 }
  0x23   :  { %387 = vmatpush3.bf16.xpose.msra.mxu0 %v423_v5 }
  0x24   :  { %388 = vmatprep.subr.bf16.mxu0 %v424_v6 }
  0x2b   :  { %389 = vmatpush3.bf16.xpose.msra.mxu0 %v424_v6 }
  0x2c   :  { %390 = vmatprep.subr.bf16.mxu0 %v425_v7 }
  0x33   :  { %391 = vmatpush3.bf16.xpose.msra.mxu0 %v425_v7 }
  0x34   :  { %392 = vmatprep.subr.bf16.mxu0 %v426_v8 }
  0x3b   :  { %393 = vmatpush3.bf16.xpose.msra.mxu0 %v426_v8 }
  0x42   :  { %395 = vmatmul.mubr.bf16.vlgmr.msra.gmra.mrb[0].mxu0 %v428_v9 }
 0x115   :  { %v396_v10 = vpop.f32.mrb[0].mxu0 }
 0x116   :  { %v147_v12 = vmul.f32 2.0, %v396_v10  ;;  %v129_v13 = vpop.f32.mrb[1].mxu0 }
 0x117   :  { %v145_v14 = vmul.f32 2.0, %v129_v13  ;;  %v397_v15 = vpop.f32.mrb[2].mxu0  ;;  %v429_v13 = vmov 1.0|1.0  }
 0x118   :  { %v148_v16 = vmul.f32 2.0, %v397_v15  ;;  %v132_v17 = vpop.f32.mrb[3].mxu0  ;;  %v157_v18 = vsub.f32 %v330_v11, %v147_v12 }
 0x119   :  { %v146_v19 = vmul.f32 2.0, %v132_v17  ;;  %v155_v20 = vsub.f32 %v330_v11, %v145_v14 }
 0x11a   :  { %165 = vmin.xlane.f32.xlu1 %v157_v18  ;;  %v158_v21 = vsub.f32 %v330_v11, %v148_v16 }
 0x11b   :  { %161 = vmin.xlane.f32.xlu0 %v155_v20  ;;  %v156_v22 = vsub.f32 %v330_v11, %v146_v19 }
 0x11e   :  { %167 = vmin.xlane.f32.xlu1 %v158_v21 }
 0x11f   :  { %163 = vmin.xlane.f32.xlu0 %v156_v22 }
 0x1a7   :  { %v166_v25 = vpop.xlane.xlu1 %165 }
 0x1a8   :  { %vm171_vm0 = vcmp.le.f32.partialorder %v157_v18, %v166_v25  ;;  %v162_v26 = vpop.xlane.xlu0 %161 }
 0x1a9   :  { %vm169_vm1 = vcmp.le.f32.partialorder %v155_v20, %v162_v26  ;;  %v175_v27 = vsel %vm171_vm0, %v483_v24, 128 }
 0x1aa   :  { %v173_v28 = vsel %vm169_vm1, %v483_v24, 128  ;;  %v206_v33 = vshra.s32 %v175_v27, 16  ;;  %v205_v42 = vand.u32 65535, %v175_v27 }
 0x1ab   :  { %v168_v29 = vpop.xlane.xlu1 %167  ;;  %v178_v30 = vshra.s32 %v173_v28, 16  ;;  %v177_v41 = vand.u32 65535, %v173_v28 }
 0x1ac   :  { %vm172_vm2 = vcmp.le.f32.partialorder %v158_v21, %v168_v29  ;;  %v164_v31 = vpop.xlane.xlu0 %163  ;;  %v208_v37 = vcvt.s32.f32 %v206_v33  ;;  %v207_v51 = vcvt.s32.f32 %v205_v42 }
 0x1ad   :  { %vm170_vm3 = vcmp.le.f32.partialorder %v156_v22, %v164_v31  ;;  %v180_v32 = vcvt.s32.f32 %v178_v30  ;;  %v176_v34 = vsel %vm172_vm2, %v483_v24, 128  ;;  %v179_v45 = vcvt.s32.f32 %v177_v41 }
 0x1ae   :  { %v174_v35 = vsel %vm170_vm3, %v483_v24, 128  ;;  %v220_v39 = vshra.s32 %v176_v34, 16  ;;  %v219_v47 = vand.u32 65535, %v176_v34 }
 0x1af   :  { %181 = vmin.xlane.f32.xlu0 %v180_v32  ;;  %v192_v36 = vshra.s32 %v174_v35, 16  ;;  %v191_v43 = vand.u32 65535, %v174_v35 }
 0x1b0   :  { %v222_v40 = vcvt.s32.f32 %v220_v39  ;;  %v221_v55 = vcvt.s32.f32 %v219_v47 }
 0x1b1   :  { %v194_v38 = vcvt.s32.f32 %v192_v36  ;;  %v193_v50 = vcvt.s32.f32 %v191_v43 }
 0x1b3   :  { %209 = vmin.xlane.f32.xlu0 %v208_v37  ;;  %195 = vmin.xlane.f32.xlu1 %v194_v38 }
 0x1b7   :  { %223 = vmin.xlane.f32.xlu1 %v222_v40 }
 0x23c   :  { %v182_v44 = vpop.xlane.xlu0 %181 }
 0x23d   :  { %vm183_vm4 = vcmp.eq.f32.partialorder %v180_v32, %v182_v44  ;;  %v188_v57 = vcvt.f32.s32 %v182_v44 }
 0x23e   :  { %v184_v46 = vsel %vm183_vm4, %v179_v45, inf }
 0x23f   :  { %185 = vmin.xlane.f32.xlu0 %v184_v46  ;;  %v189_v61 = vshll.u32 %v188_v57, 16 }
 0x240   :  { %v196_v48 = vpop.xlane.xlu1 %195  ;;  %v210_v49 = vpop.xlane.xlu0 %209 }
 0x241   :  { %vm197_vm5 = vcmp.eq.f32.partialorder %v194_v38, %v196_v48  ;;  %vm211_vm6 = vcmp.eq.f32.partialorder %v208_v37, %v210_v49  ;;  %v202_v59 = vcvt.f32.s32 %v196_v48  ;;  %v216_v62 = vcvt.f32.s32 %v210_v49 }
 0x242   :  { %v198_v52 = vsel %vm197_vm5, %v193_v50, inf  ;;  %v212_v53 = vsel %vm211_vm6, %v207_v51, inf }
 0x243   :  { %199 = vmin.xlane.f32.xlu1 %v198_v52  ;;  %213 = vmin.xlane.f32.xlu0 %v212_v53  ;;  %v203_v2 = vshll.u32 %v202_v59, 16  ;;  %v217_v6 = vshll.u32 %v216_v62, 16 }
 0x244   :  { %v224_v54 = vpop.xlane.xlu1 %223 }
 0x245   :  { %vm225_vm7 = vcmp.eq.f32.partialorder %v222_v40, %v224_v54  ;;  %v230_v63 = vcvt.f32.s32 %v224_v54 }
 0x246   :  { %v226_v56 = vsel %vm225_vm7, %v221_v55, inf }
 0x247   :  { %227 = vmin.xlane.f32.xlu1 %v226_v56  ;;  %v231_v8 = vshll.u32 %v230_v63, 16 }
 0x2cc   :  { %v186_v58 = vpop.xlane.xlu0 %185 }
 0x2cd   :  { %v187_v60 = vcvt.f32.s32 %v186_v58 }
 0x2cf   :  { %v190_v3 = vadd.s32 %v189_v61, %v187_v60 }
 0x2d0   :  { %v200_v0 = vpop.xlane.xlu1 %199  ;;  %v214_v1 = vpop.xlane.xlu0 %213 }
 0x2d1   :  { %v201_v4 = vcvt.f32.s32 %v200_v0  ;;  %v215_v5 = vcvt.f32.s32 %v214_v1  ;;  %vm233_vm8 = vcmp.eq.s32.totalorder %v483_v24, %v190_v3 }
 0x2d3   :  { %v204_v7 = vadd.s32 %v203_v2, %v201_v4  ;;  %v218_v10 = vadd.s32 %v217_v6, %v215_v5 }
 0x2d4   :  { %v228_v9 = vpop.xlane.xlu1 %227 }
 0x2d5   :  { %v229_v11 = vcvt.f32.s32 %v228_v9  ;;  %vm234_vm9 = vcmp.eq.s32.totalorder %v483_v24, %v204_v7  ;;  %vm235_vm11 = vcmp.eq.s32.totalorder %v483_v24, %v218_v10 }
 0x2d6   :  { %vm335_vm10 = vmpackc.low %vm234_vm9, %vm233_vm8 }
 0x2d7   :  { %v232_v12 = vadd.s32 %v231_v8, %v229_v11  ;;  %414 = vmatprep.mubr.msk.bf16.mxu1 %vm335_vm10, %v429_v13 }
 0x2d9   :  { %vm236_vm12 = vcmp.eq.s32.totalorder %v483_v24, %v232_v12 }
 0x2da   :  { %vm337_vm13 = vmpackc.low %vm236_vm12, %vm235_vm11 }
 0x2db   :  { %415 = vmatmul.mubr.msk.bf16.vlgmr.msra.gmra.mrb[0].mxu1 %vm337_vm13, %v429_v13 }
 0x3ae   :  { %v416_v14 = vpop.f32.mrb[0].mxu1 }
 0x3af   :  { %v281_v15 = vpop.f32.mrb[1].mxu1 }
 0x3b0   :  { %v417_v16 = vpop.f32.mrb[2].mxu1 }
 0x3b1   :  { %v355_v17 = vpack.c.bf16 %v417_v16, %v416_v14  ;;  %v284_v18 = vpop.f32.mrb[3].mxu1 }
 0x3b2   :  { %v350_v19 = vpack.c.bf16 %v284_v18, %v281_v15 }
 0x3b3   :  { %357 = vst [vmem:[%s502_s3 + $0x8] sm:$0xff] %v355_v17  }
 0x3b4   :  { %351 = vst [vmem:[%s502_s3] sm:$0xff] %v350_v19  }

// kernel: vq_vae_forward.16
= control target key start
LH: loop header
LB: loop body
LE: loop exit
PB: predicated region body
PF: predicated region fallthrough
CT: control target
= control target key end

     0   :  { %s599_s12 = smov 0   ;;  %s601_s13 = smov 0   ;;  %s646_s0 = inlined_call_operand.vmem [shape: bf16[4,32,64], index: 0, kind: input, shape index: {}]   ;;  %s647_s1 = inlined_call_operand.vmem [shape: bf16[4,64,128], index: 1, kind: input, shape index: {}]   ;;  %s648_s2 = inlined_call_operand.vmem [shape: f32[1,128], index: 2, kind: input, shape index: {}]   ;;  %s649_s3 = inlined_call_operand.vmem [shape: bf16[4,32,128], index: 3, kind: output, shape index: {}]  }
   0x1   :  { %s603_s14 = smov 0  }
   0x2 LB: > { %s25_s15 = sadd.s32 1, %s573_s13  ;;  %p467_p0 = scmp.ge.s32.totalorder %s577_s14, 1  ;;  %s577_s14 = sphi %s603_s14, %s13_s14   ;;  %s573_s13 = sphi %s601_s13, %s651_s13   ;;  %s569_s12 = sphi %s599_s12, %s650_s12  }
   0x3   : > { %p27_p1 = scmp.ge.s32.totalorder %s25_s15, 4  ;;  %p168_p2 = scmp.lt.s32.totalorder %s577_s14, 5 }
   0x5   : > { %s653_s15 = smov (%p27_p1, %s25_s15), 0  ;;  %p169_p3 = pnand %p467_p0, %p168_p2 }
   0x6   : > { %p206_p4 = scmp.lt.s32.totalorder (!%p169_p3), %s569_s12, 3  ;;  %vm284_vm0 = vcmask (!%p169_p3), 523264   ;;  %v474_v6 = vld [vmem:[%s648_s2] ss:$0 sm:$0xff] (!%p169_p3) }
   0x7   : > { %172 = sbr.rel (%p169_p3) target bundleno = 256 (0x100), region = 32 }
   0xe   : > { %s655_s12 = smov (!%p206_p4, %s569_s12), 3 }
   0xf   : > { %s490_s16 = sshll.u32 %s655_s12, 5  ;;  %s489_s17 = sshll.u32 %s655_s12, 4 }
  0x10   : > { %s219_s20 = scalar_lea.vmem %s647_s1, %s490_s16  ;;  %s213_s23 = scalar_lea.vmem %s646_s0, %s489_s17 }
  0x11   : > { %v549_v0 = vld [vmem:[%s219_s20] sm:$0xff]   ;;  %v550_v1 = vld [vmem:[%s219_s20 + $0x8] sm:$0xff]   ;;  %v551_v2 = vld [vmem:[%s219_s20 + $0x10] sm:$0xff]   ;;  %s228_s28 = scalar_lea.vmem %s649_s3, %s489_s17 }
  0x12   : > { %513 = vmatprep.subr.bf16.mxu0 %v549_v0  ;;  %v553_v3 = vld [vmem:[%s213_s23] sm:$0xff]   ;;  %v552_v4 = vld [vmem:[%s219_s20 + $0x18] sm:$0xff]   ;;  %v554_v5 = vld [vmem:[%s213_s23 + $0x8] sm:$0xff]  }
  0x13   : > { %514 = vmatpush3.bf16.msra.mxu0 %v549_v0  ;;  %521 = vmatprep.mubr.msk.bf16.mxu0 %vm284_vm0, %v553_v3 }
  0x14   : > { %515 = vmatprep.subr.bf16.mxu0 %v550_v1 }
  0x17   : > { %516 = vmatpush3.bf16.msra.mxu0 %v550_v1 }
  0x18   : > { %517 = vmatprep.subr.bf16.mxu0 %v551_v2 }
  0x1b   : > { %518 = vmatpush3.bf16.msra.mxu0 %v551_v2 }
  0x1c   : > { %519 = vmatprep.subr.bf16.mxu0 %v552_v4 }
  0x1f   : > { %520 = vmatpush3.bf16.msra.mxu0 %v552_v4 }
  0x22   : > { %522 = vmatmul.mubr.msk.bf16.vlgmr.msra.gmra.mrb[0].mxu0 %vm284_vm0, %v554_v5 }
  0xf5   : > { %v523_v7 = vpop.f32.mrb[0].mxu0 }
  0xf6   : > { %v334_v8 = vadd.f32 %v523_v7, %v474_v6  ;;  %v325_v9 = vpop.f32.mrb[1].mxu0 }
  0xf7   : > { %v326_v10 = vadd.f32 %v474_v6, %v325_v9  ;;  %v524_v11 = vpop.f32.mrb[2].mxu0 }
  0xf8   : > { %v337_v12 = vadd.f32 %v524_v11, %v474_v6  ;;  %v328_v13 = vpop.f32.mrb[3].mxu0  ;;  %v342_v15 = vmax.f32 %v334_v8, 0.0 }
  0xf9   : > { %v329_v14 = vadd.f32 %v474_v6, %v328_v13  ;;  %v340_v17 = vmax.f32 %v326_v10, 0.0 }
  0xfa   : > { %v343_v16 = vmax.f32 %v337_v12, 0.0 }
  0xfb   : > { %v341_v18 = vmax.f32 %v329_v14, 0.0 }
  0xfc   : > { %v504_v19 = vpack.c.bf16 %v343_v16, %v342_v15 }
  0xfd   : > { %v499_v20 = vpack.c.bf16 %v341_v18, %v340_v17 }
  0xfe   : > { %506 = vst [vmem:[%s228_s28 + $0x8] sm:$0xff] %v504_v19  }
  0xff   : > { %500 = vst [vmem:[%s228_s28] sm:$0xff] %v499_v20  }
 0x100 PF: > { %s13_s14 = sadd.s32 1, %s577_s14   ;;  %s650_s12 = smov %s573_s13 }
 0x101   : > { %p10_p5 = scmp.ge.s32.totalorder %s13_s14, 6   ;;  %s651_s13 = smov %s653_s15 }
 0x103   :  { %12 = sbr.rel (!%p10_p5) target bundleno = 2 (0x2), region = 65 }

// kernel: vq_vae_forward.17
= control target key start
LH: loop header
LB: loop body
LE: loop exit
PB: predicated region body
PF: predicated region fallthrough
CT: control target
= control target key end

     0   :  { %s655_s12 = smov 0   ;;  %s657_s13 = smov 0   ;;  %s720_s0 = inlined_call_operand.vmem [shape: bf16[4,128,64], index: 0, kind: input, shape index: {}]   ;;  %s721_s1 = inlined_call_operand.vmem [shape: bf16[4,64,128], index: 1, kind: input, shape index: {}]   ;;  %s722_s2 = inlined_call_operand.vmem [shape: f32[1,128], index: 2, kind: input, shape index: {}]   ;;  %s723_s3 = inlined_call_operand.vmem [shape: f32[4,128,128], index: 3, kind: output, shape index: {}]  }
   0x1   :  { %s659_s14 = smov 0   ;;  %s661_s15 = smov 0  }
   0x2   :  { %s663_s16 = smov 0  }
   0x3 LB: > { %s22_s17 = sadd.s32 1, %s625_s14  ;;  %s25_s18 = sadd.s32 1, %s629_s15  ;;  %s633_s16 = sphi %s663_s16, %s13_s16   ;;  %s629_s15 = sphi %s661_s15, %s727_s15   ;;  %s625_s14 = sphi %s659_s14, %s726_s14   ;;  %s621_s13 = sphi %s657_s13, %s725_s13   ;;  %s617_s12 = sphi %s655_s12, %s724_s12  }
   0x4   : > { %p23_p0 = scmp.ge.s32.totalorder %s22_s17, 2  ;;  %p490_p1 = scmp.ge.s32.totalorder %s633_s16, 1 }
   0x5   : > { %p168_p2 = scmp.lt.s32.totalorder %s633_s16, 9 }
   0x6   : > { %s729_s17 = smov (%p23_p0, %s22_s17), 0  ;;  %s731_s18 = smov (!%p23_p0, %s25_s18), %s629_s15 }
   0x7   : > { %p169_p3 = pnand %p490_p1, %p168_p2  ;;  %p27_p4 = scmp.ge.s32.totalorder %s731_s18, 4 }
   0x8   : > { %p206_p5 = scmp.lt.s32.totalorder (!%p169_p3), %s621_s13, 3  ;;  %s491_s19 = sshll.u32 (!%p169_p3), %s617_s12, 3  ;;  %vm298_vm0 = vcmask (!%p169_p3), 523264   ;;  %v499_v8 = vld [vmem:[%s722_s2] ss:$0 sm:$0xff] (!%p169_p3) }
   0x9   : > { %s733_s18 = smov (%p27_p4, %s731_s18), 0  ;;  %172 = sbr.rel (%p169_p3) target bundleno = 254 (0xfe), region = 32 }
   0xa   : > { %p208_p6 = scmp.lt.s32.totalorder (!%p169_p3), %s491_s19, 15 }
  0x10   : > { %s735_s13 = smov (!%p206_p5, %s621_s13), 3  ;;  %s737_s19 = smov (!%p208_p6, %s491_s19), 15 }
  0x11   : > { %s514_s20 = sshll.u32 %s735_s13, 5  ;;  %s492_s21 = sshll.u32 %s735_s13, 4 }
  0x12   : > { %s219_s24 = scalar_lea.vmem %s721_s1, %s514_s20  ;;  %s688_s25 = sadd.s32 %s492_s21, %s737_s19 }
  0x13   : > { %v587_v0 = vld [vmem:[%s219_s24] sm:$0xff]   ;;  %s493_s26 = sshll.u32 %s688_s25, 2  ;;  %v588_v1 = vld [vmem:[%s219_s24 + $0x8] sm:$0xff]   ;;  %v589_v2 = vld [vmem:[%s219_s24 + $0x10] sm:$0xff]   ;;  %s498_s30 = sshll.u32 %s688_s25, 3 }
  0x14   : > { %s213_s29 = scalar_lea.vmem %s720_s0, %s493_s26  ;;  %523 = vmatprep.subr.bf16.mxu0 %v587_v0  ;;  %539 = vmatprep.subr.bf16.mxu1 %v587_v0  ;;  %v590_v5 = vld [vmem:[%s219_s24 + $0x18] sm:$0xff]   ;;  %s228_s8 = scalar_lea.vmem %s723_s3, %s498_s30 }
  0x15   : > { %524 = vmatpush3.bf16.msra.mxu0 %v587_v0  ;;  %543 = vmatpush3.bf16.msra.mxu1 %v587_v0  ;;  %v591_v3 = vld [vmem:[%s213_s29] sm:$0xff]   ;;  %v592_v4 = vld [vmem:[%s213_s29 + $0x10] sm:$0xff]   ;;  %v593_v6 = vld [vmem:[%s213_s29 + $0x8] sm:$0xff]  }
  0x16   : > { %525 = vmatprep.subr.bf16.mxu0 %v588_v1  ;;  %540 = vmatprep.subr.bf16.mxu1 %v588_v1  ;;  %v594_v7 = vld [vmem:[%s213_s29 + $0x18] sm:$0xff]  }
  0x17   : > { %531 = vmatprep.mubr.msk.bf16.mxu0 %vm298_vm0, %v591_v3  ;;  %535 = vmatprep.mubr.msk.bf16.mxu1 %vm298_vm0, %v592_v4 }
  0x19   : > { %526 = vmatpush3.bf16.msra.mxu0 %v588_v1  ;;  %544 = vmatpush3.bf16.msra.mxu1 %v588_v1 }
  0x1a   : > { %527 = vmatprep.subr.bf16.mxu0 %v589_v2  ;;  %541 = vmatprep.subr.bf16.mxu1 %v589_v2 }
  0x1d   : > { %528 = vmatpush3.bf16.msra.mxu0 %v589_v2  ;;  %545 = vmatpush3.bf16.msra.mxu1 %v589_v2 }
  0x1e   : > { %529 = vmatprep.subr.bf16.mxu0 %v590_v5  ;;  %542 = vmatprep.subr.bf16.mxu1 %v590_v5 }
  0x21   : > { %530 = vmatpush3.bf16.msra.mxu0 %v590_v5  ;;  %546 = vmatpush3.bf16.msra.mxu1 %v590_v5 }
  0x24   : > { %532 = vmatmul.mubr.msk.bf16.vlgmr.msra.gmra.mrb[0].mxu0 %vm298_vm0, %v593_v6  ;;  %536 = vmatmul.mubr.msk.bf16.vlgmr.msra.gmra.mrb[0].mxu1 %vm298_vm0, %v594_v7 }
  0xf7   : > { %v533_v9 = vpop.f32.mrb[0].mxu0  ;;  %v537_v10 = vpop.f32.mrb[0].mxu1 }
  0xf8   : > { %v354_v11 = vadd.f32 %v533_v9, %v499_v8  ;;  %v370_v12 = vadd.f32 %v537_v10, %v499_v8  ;;  %v345_v13 = vpop.f32.mrb[1].mxu0  ;;  %v361_v14 = vpop.f32.mrb[1].mxu1 }
  0xf9   : > { %v346_v15 = vadd.f32 %v499_v8, %v345_v13  ;;  %v362_v16 = vadd.f32 %v499_v8, %v361_v14  ;;  %v534_v17 = vpop.f32.mrb[2].mxu0  ;;  %v538_v18 = vpop.f32.mrb[2].mxu1 }
  0xfa   : > { %378 = vst [vmem:[%s228_s8 + $0x10] sm:$0xff] %v354_v11  ;;  %382 = vst [vmem:[%s228_s8 + $0x30] sm:$0xff] %v370_v12  ;;  %v357_v19 = vadd.f32 %v534_v17, %v499_v8  ;;  %v373_v20 = vadd.f32 %v538_v18, %v499_v8  ;;  %v348_v21 = vpop.f32.mrb[3].mxu0  ;;  %v364_v22 = vpop.f32.mrb[3].mxu1 }
  0xfb   : > { %376 = vst [vmem:[%s228_s8] sm:$0xff] %v346_v15  ;;  %380 = vst [vmem:[%s228_s8 + $0x20] sm:$0xff] %v362_v16  ;;  %v349_v23 = vadd.f32 %v499_v8, %v348_v21  ;;  %v365_v24 = vadd.f32 %v499_v8, %v364_v22 }
  0xfc   : > { %379 = vst [vmem:[%s228_s8 + $0x18] sm:$0xff] %v357_v19  ;;  %383 = vst [vmem:[%s228_s8 + $0x38] sm:$0xff] %v373_v20 }
  0xfd   : > { %377 = vst [vmem:[%s228_s8 + $0x8] sm:$0xff] %v349_v23  ;;  %381 = vst [vmem:[%s228_s8 + $0x28] sm:$0xff] %v365_v24 }
  0xfe PF: > { %s13_s16 = sadd.s32 1, %s633_s16   ;;  %s724_s12 = smov %s625_s14 }
  0xff   : > { %p10_p7 = scmp.ge.s32.totalorder %s13_s16, 10   ;;  %s725_s13 = smov %s629_s15 }
 0x100   : > { %s726_s14 = smov %s729_s17  ;;  %s727_s15 = smov %s733_s18 }
 0x101   :  { %12 = sbr.rel (!%p10_p7) target bundleno = 3 (0x3), region = 65 }

</bundles_post_ra>
